<compile_context>
chip_gen: v5e
topology: v5e:2x2
jax: 0.10.0
libtpu: 0.0.40
codegen_flags: <defaults>
</compile_context>

<pallas_src>
import functools

import jax
import jax.numpy as jnp
import numpy as np
from jax import lax
from jax.experimental import pallas as pl
from jax.experimental.pallas import tpu as pltpu


def _round_up(n, m):
    return ((n + m - 1) // m) * m


# ----------------------------------------------------------------------------
# Kernel
# ----------------------------------------------------------------------------
def agpcn_kernel(
    scaler_ref,   # (T,)                 SMEM   scaler_T_param flattened
    x_ref,        # (N_pad, F_pad) f32   VMEM   node features (resident)
    a_ref,        # (TR, N_pad)   bf16   VMEM   streamed row tile of dense A
    w1_ref,       # (F_pad, H_pad)       first_layers.weight^T
    b1_ref,       # (1, H_pad)
    wx_ref,       # (L-1|1, H_pad, H_pad) layers_X[a].weight^T stacked
    bx_ref,       # (L-1|1, 1, H_pad)
    ww_ref,       # (H_pad, H_pad)       weight.weight^T
    bw_ref,       # (1, H_pad)
    wl_ref,       # (H_pad, C_pad)       last_layers.weight^T
    bl_ref,       # (1, C_pad)
    out_ref,      # (TR, C_pad) f32      output row tile (log_softmax)
    out_state,    # (N_pad, H_pad) f32   scratch: node state (persists)
    h_state,      # (N_pad, H_pad) bf16  scratch: h = out @ Ww + bw snapshot
    *,
    feat_layers,
    nclass,
    w_relu,
    w_relu_A,
):
    f32 = jnp.float32
    t = pl.program_id(0)          # propagation step (outer, sequential)
    r = pl.program_id(1)          # row tile of N (inner)
    T = pl.num_programs(0)
    row_tile = a_ref.shape[0]

    # ---- one-time feature MLP: out = relu(x @ W1 + b1), extra layers -------
    @pl.when(jnp.logical_and(t == 0, r == 0))
    def _init():
        feat = jnp.dot(x_ref[...], w1_ref[...], preferred_element_type=f32)
        feat = feat + b1_ref[...]
        if w_relu:
            feat = jnp.maximum(feat, 0.0)
        for a in range(feat_layers - 1):
            feat = jnp.dot(feat, wx_ref[a], preferred_element_type=f32) + bx_ref[a]
            if w_relu:
                feat = jnp.maximum(feat, 0.0)
        out_state[...] = feat

    # ---- start of each propagation step: snapshot h = out @ Ww + bw (bf16) -
    @pl.when(r == 0)
    def _compute_h():
        h = jnp.dot(out_state[...], ww_ref[...], preferred_element_type=f32)
        h = h + bw_ref[...]
        h_state[...] = h.astype(h_state.dtype)

    # ---- row-tile propagation: p = A[rows,:] @ h ; out[rows] += s_t*relu(p) -
    p = jnp.dot(a_ref[...], h_state[...], preferred_element_type=f32)
    if w_relu_A:
        p = jnp.maximum(p, 0.0)
    s_t = scaler_ref[t]                              # scalar from SMEM
    row0 = pl.multiple_of(r * row_tile, row_tile)
    rows = pl.ds(row0, row_tile)
    new_rows = out_state[rows, :] + s_t * p
    out_state[rows, :] = new_rows

    # ---- last step: classifier + masked log_softmax, lane-dense store ------
    @pl.when(t == T - 1)
    def _final():
        logits = jnp.dot(new_rows, wl_ref[...], preferred_element_type=f32)
        logits = logits + bl_ref[...]
        col = lax.broadcasted_iota(jnp.int32, logits.shape, 1)
        valid = col < nclass
        z = jnp.where(valid, logits, jnp.float32(-1e30))
        m = jnp.max(z, axis=-1, keepdims=True)
        e = jnp.where(valid, jnp.exp(z - m), 0.0)
        lse = jnp.log(jnp.sum(e, axis=-1, keepdims=True))
        out_ref[...] = (z - m - lse).astype(out_ref.dtype)


# ----------------------------------------------------------------------------
# Wrapper: padding, weight transposition, pallas_call
# ----------------------------------------------------------------------------
def agpcn_forward(x, A1, params, *, feat_layers, T, w_relu, row_tile=128):
    N, F = x.shape
    H = params["W1"].shape[0]
    C = params["Wl"].shape[0]
    w_relu_A = w_relu  # reproduce module's `self.w_relu_A = w_relu`

    LANE = 128
    H_pad = _round_up(H, LANE)
    C_pad = _round_up(C, LANE)
    F_pad = _round_up(F, LANE)
    N_pad = _round_up(N, row_tile)
    R = N_pad // row_tile

    def pad2(a, rr, cc):
        a = jnp.asarray(a, jnp.float32)
        return jnp.pad(a, ((0, rr - a.shape[0]), (0, cc - a.shape[1])))

    x_p = pad2(x, N_pad, F_pad)
    A_p = pad2(A1, N_pad, N_pad).astype(jnp.bfloat16)        # streamed in bf16

    w1t = pad2(params["W1"].T, F_pad, H_pad)
    b1 = pad2(params["b1"].reshape(1, -1), 1, H_pad)
    if feat_layers > 1:
        wx = jnp.stack([pad2(w.T, H_pad, H_pad) for w in params["Wx"]], 0)
        bx = jnp.stack([pad2(b.reshape(1, -1), 1, H_pad) for b in params["bx"]], 0)
    else:
        wx = jnp.zeros((1, H_pad, H_pad), jnp.float32)       # unused dummy
        bx = jnp.zeros((1, 1, H_pad), jnp.float32)
    wwt = pad2(params["Ww"].T, H_pad, H_pad)
    bw = pad2(params["bw"].reshape(1, -1), 1, H_pad)
    wlt = pad2(params["Wl"].T, H_pad, C_pad)
    bl = pad2(params["bl"].reshape(1, -1), 1, C_pad)
    scaler = jnp.asarray(params["scaler_T"], jnp.float32).reshape(-1)  # (T,)

    kernel = functools.partial(
        agpcn_kernel,
        feat_layers=feat_layers,
        nclass=C,
        w_relu=w_relu,
        w_relu_A=w_relu_A,
    )

    def full(shape):
        return pl.BlockSpec(shape, lambda t, r, _s=shape: (0,) * len(_s))

    grid_spec = pltpu.PrefetchScalarGridSpec(
        num_scalar_prefetch=0,
        grid=(T, R),
        in_specs=[
            pl.BlockSpec(memory_space=pltpu.MemorySpace.SMEM),      # scaler
            full(x_p.shape),                                        # x (resident)
            pl.BlockSpec((row_tile, N_pad), lambda t, r: (r, 0)),   # A row stream
            full(w1t.shape), full(b1.shape),
            full(wx.shape), full(bx.shape),
            full(wwt.shape), full(bw.shape),
            full(wlt.shape), full(bl.shape),
        ],
        out_specs=pl.BlockSpec((row_tile, C_pad), lambda t, r: (r, 0)),
        scratch_shapes=[
            pltpu.VMEM((N_pad, H_pad), jnp.float32),   # out_state
            pltpu.VMEM((N_pad, H_pad), jnp.bfloat16),  # h snapshot
        ],
    )

    out_pad = pl.pallas_call(
        kernel,
        out_shape=jax.ShapeDtypeStruct((N_pad, C_pad), jnp.float32),
        grid_spec=grid_spec,
        compiler_params=pltpu.CompilerParams(
            dimension_semantics=("arbitrary", "arbitrary"),
            vmem_limit_bytes=48 * 1024 * 1024,
        ),
    )(scaler, x_p, A_p, w1t, b1, wx, bx, wwt, bw, wlt, bl)

    return out_pad[:N, :C]


# ----------------------------------------------------------------------------
# Pure-JAX (f32) reference for correctness check
# ----------------------------------------------------------------------------
def agpcn_reference(x, A1, params, *, feat_layers, T, w_relu):
    w_relu_A = w_relu
    out = x @ params["W1"].T + params["b1"]
    if w_relu:
        out = jnp.maximum(out, 0.0)
    for a in range(feat_layers - 1):
        out = out @ params["Wx"][a].T + params["bx"][a]
        if w_relu:
            out = jnp.maximum(out, 0.0)
    for i in range(T):
        p = A1 @ (out @ params["Ww"].T + params["bw"])
        if w_relu_A:
            p = jnp.maximum(p, 0.0)
        out = out + params["scaler_T"][i, 0] * p
    logits = out @ params["Wl"].T + params["bl"]
    return jax.nn.log_softmax(logits, axis=-1)


if __name__ == "__main__":
    # Small, module-consistent config (non-multiples of 128 to exercise padding
    # and multiple row tiles).
    num_nodes = 200
    n_features = 48
    nc_hidden = 32
    nclass = 7
    feat_layers = 2
    T = 3
    w_relu = True

    key = jax.random.PRNGKey(0)
    keys = jax.random.split(key, 16)

    x = jax.random.normal(keys[0], (num_nodes, n_features), jnp.float32)
    A_raw = jax.random.uniform(keys[1], (num_nodes, num_nodes), jnp.float32)
    A_raw = (A_raw < 0.15).astype(jnp.float32) + jnp.eye(num_nodes, dtype=jnp.float32)
    A1 = A_raw / jnp.sum(A_raw, axis=1, keepdims=True)   # row-normalized dense adjacency

    def lin(k, out_dim, in_dim):
        bound = 1.0 / np.sqrt(in_dim)
        kw, kb = jax.random.split(k)
        W = jax.random.uniform(kw, (out_dim, in_dim), jnp.float32, -bound, bound)
        b = jax.random.uniform(kb, (out_dim,), jnp.float32, -bound, bound)
        return W, b

    W1, b1 = lin(keys[2], nc_hidden, n_features)
    Wx, bx = [], []
    for a in range(feat_layers - 1):
        W, b = lin(keys[3 + a], nc_hidden, nc_hidden)
        Wx.append(W)
        bx.append(b)
    Ww, bw = lin(keys[8], nc_hidden, nc_hidden)
    Wl, bl = lin(keys[9], nclass, nc_hidden)
    scaler_T = jax.random.normal(keys[10], (T, 1), jnp.float32)

    params = dict(W1=W1, b1=b1, Wx=Wx, bx=bx, Ww=Ww, bw=bw,
                  Wl=Wl, bl=bl, scaler_T=scaler_T)

    out = agpcn_forward(x, A1, params, feat_layers=feat_layers, T=T,
                        w_relu=w_relu, row_tile=128)
    out = jax.block_until_ready(out)

    ref = agpcn_reference(x, A1, params, feat_layers=feat_layers, T=T,
                          w_relu=w_relu)
    # bf16 adjacency/activation path vs f32 reference -> loose tolerance.
    np.testing.assert_allclose(np.asarray(out), np.asarray(ref),
                               rtol=5e-2, atol=5e-2)

    print("KERNEL_OK")
</pallas_src>

<mosaic_0001>
module attributes {stable_mosaic.version = 11 : i64} {
  func.func @agpcn_kernel(%arg0: i32, %arg1: i32, %arg2: memref<3xf32, #tpu.memory_space<smem>>, %arg3: memref<256x128xf32, #tpu.memory_space<vmem>>, %arg4: memref<128x256xbf16, #tpu.memory_space<vmem>>, %arg5: memref<128x128xf32, #tpu.memory_space<vmem>>, %arg6: memref<1x128xf32, #tpu.memory_space<vmem>>, %arg7: memref<1x128x128xf32, #tpu.memory_space<vmem>>, %arg8: memref<1x1x128xf32, #tpu.memory_space<vmem>>, %arg9: memref<128x128xf32, #tpu.memory_space<vmem>>, %arg10: memref<1x128xf32, #tpu.memory_space<vmem>>, %arg11: memref<128x128xf32, #tpu.memory_space<vmem>>, %arg12: memref<1x128xf32, #tpu.memory_space<vmem>>, %arg13: memref<128x128xf32, #tpu.memory_space<vmem>>, %arg14: memref<256x128xf32, #tpu.memory_space<vmem>>, %arg15: memref<256x128xbf16, #tpu.memory_space<vmem>>) attributes {dimension_semantics = [#tpu.dimension_semantics<arbitrary>, #tpu.dimension_semantics<arbitrary>], iteration_bounds = array<i64: 3, 2>, scalar_prefetch = 0 : i64, scratch_operands = 2 : i64, tpu.core_type = #tpu.core_type<tc>, window_params = [{transform_indices = @transform_0, window_bounds = array<i64: 3>}, {pipeline_mode = #tpu.pipeline_mode<synchronous>, transform_indices = @transform_1, window_bounds = array<i64: 256, 128>}, {transform_indices = @transform_2, window_bounds = array<i64: 128, 256>}, {pipeline_mode = #tpu.pipeline_mode<synchronous>, transform_indices = @transform_3, window_bounds = array<i64: 128, 128>}, {pipeline_mode = #tpu.pipeline_mode<synchronous>, transform_indices = @transform_4, window_bounds = array<i64: 1, 128>}, {pipeline_mode = #tpu.pipeline_mode<synchronous>, transform_indices = @transform_5, window_bounds = array<i64: 1, 128, 128>}, {pipeline_mode = #tpu.pipeline_mode<synchronous>, transform_indices = @transform_6, window_bounds = array<i64: 1, 1, 128>}, {pipeline_mode = #tpu.pipeline_mode<synchronous>, transform_indices = @transform_7, window_bounds = array<i64: 128, 128>}, {pipeline_mode = #tpu.pipeline_mode<synchronous>, transform_indices = @transform_8, window_bounds = array<i64: 1, 128>}, {pipeline_mode = #tpu.pipeline_mode<synchronous>, transform_indices = @transform_9, window_bounds = array<i64: 128, 128>}, {pipeline_mode = #tpu.pipeline_mode<synchronous>, transform_indices = @transform_10, window_bounds = array<i64: 1, 128>}, {transform_indices = @transform_11, window_bounds = array<i64: 128, 128>}]} {
    %c0_i32 = arith.constant 0 : i32
    %0 = arith.cmpi eq, %arg0, %c0_i32 : i32
    %c0_i32_0 = arith.constant 0 : i32
    %1 = arith.cmpi eq, %arg1, %c0_i32_0 : i32
    %2 = arith.andi %0, %1 : i1
    %3 = arith.extui %2 : i1 to i32
    %c0_i32_1 = arith.constant 0 : i32
    %4 = arith.cmpi ne, %3, %c0_i32_1 : i32
    scf.if %4 {
      %c0_11 = arith.constant 0 : index
      %c0_12 = arith.constant 0 : index
      %27 = vector.load %arg3[%c0_11, %c0_12] : memref<256x128xf32, #tpu.memory_space<vmem>>, vector<256x128xf32>
      %c0_13 = arith.constant 0 : index
      %c0_14 = arith.constant 0 : index
      %28 = vector.load %arg5[%c0_13, %c0_14] : memref<128x128xf32, #tpu.memory_space<vmem>>, vector<128x128xf32>
      %cst_15 = arith.constant dense<0.000000e+00> : vector<256x128xf32>
      %29 = tpu.matmul %27, %28, %cst_15 {dimension_numbers = #tpu.dot_dimension_numbers<[1], [0], [0], [1], [0, 0, 1, 1], [], []>} : vector<256x128xf32>, vector<128x128xf32>, vector<256x128xf32> -> vector<256x128xf32>
      %c0_16 = arith.constant 0 : index
      %c0_17 = arith.constant 0 : index
      %30 = vector.load %arg6[%c0_16, %c0_17] : memref<1x128xf32, #tpu.memory_space<vmem>>, vector<1x128xf32>
      %31 = vector.broadcast %30 : vector<1x128xf32> to vector<256x128xf32>
      %32 = arith.addf %29, %31 : vector<256x128xf32>
      %cst_18 = arith.constant 0.000000e+00 : f32
      %33 = vector.broadcast %cst_18 : f32 to vector<256x128xf32>
      %34 = arith.maximumf %32, %33 : vector<256x128xf32>
      %c0_19 = arith.constant 0 : index
      %c0_20 = arith.constant 0 : index
      %c0_21 = arith.constant 0 : index
      %35 = vector.load %arg7[%c0_19, %c0_20, %c0_21] : memref<1x128x128xf32, #tpu.memory_space<vmem>>, vector<1x128x128xf32>
      %36 = vector.shape_cast %35 : vector<1x128x128xf32> to vector<128x128xf32>
      %cst_22 = arith.constant dense<0.000000e+00> : vector<256x128xf32>
      %37 = tpu.matmul %34, %36, %cst_22 {dimension_numbers = #tpu.dot_dimension_numbers<[1], [0], [0], [1], [0, 0, 1, 1], [], []>} : vector<256x128xf32>, vector<128x128xf32>, vector<256x128xf32> -> vector<256x128xf32>
      %c0_23 = arith.constant 0 : index
      %c0_24 = arith.constant 0 : index
      %c0_25 = arith.constant 0 : index
      %38 = vector.load %arg8[%c0_23, %c0_24, %c0_25] : memref<1x1x128xf32, #tpu.memory_space<vmem>>, vector<1x1x128xf32>
      %39 = vector.shape_cast %38 : vector<1x1x128xf32> to vector<1x128xf32>
      %40 = vector.broadcast %39 : vector<1x128xf32> to vector<256x128xf32>
      %41 = arith.addf %37, %40 : vector<256x128xf32>
      %cst_26 = arith.constant 0.000000e+00 : f32
      %42 = vector.broadcast %cst_26 : f32 to vector<256x128xf32>
      %43 = arith.maximumf %41, %42 : vector<256x128xf32>
      %c0_27 = arith.constant 0 : index
      %c0_28 = arith.constant 0 : index
      %44 = vector.load %arg14[%c0_27, %c0_28] : memref<256x128xf32, #tpu.memory_space<vmem>>, vector<256x128xf32>
      tpu.vector_store %arg14[%c0_27, %c0_28], %43 {strides = array<i32>} : memref<256x128xf32, #tpu.memory_space<vmem>>, vector<256x128xf32>,
    } else {
    }
    %c0_i32_2 = arith.constant 0 : i32
    %5 = arith.cmpi eq, %arg1, %c0_i32_2 : i32
    %6 = arith.extui %5 : i1 to i32
    %c0_i32_3 = arith.constant 0 : i32
    %7 = arith.cmpi ne, %6, %c0_i32_3 : i32
    scf.if %7 {
      %c0_11 = arith.constant 0 : index
      %c0_12 = arith.constant 0 : index
      %27 = vector.load %arg14[%c0_11, %c0_12] : memref<256x128xf32, #tpu.memory_space<vmem>>, vector<256x128xf32>
      %c0_13 = arith.constant 0 : index
      %c0_14 = arith.constant 0 : index
      %28 = vector.load %arg9[%c0_13, %c0_14] : memref<128x128xf32, #tpu.memory_space<vmem>>, vector<128x128xf32>
      %cst_15 = arith.constant dense<0.000000e+00> : vector<256x128xf32>
      %29 = tpu.matmul %27, %28, %cst_15 {dimension_numbers = #tpu.dot_dimension_numbers<[1], [0], [0], [1], [0, 0, 1, 1], [], []>} : vector<256x128xf32>, vector<128x128xf32>, vector<256x128xf32> -> vector<256x128xf32>
      %c0_16 = arith.constant 0 : index
      %c0_17 = arith.constant 0 : index
      %30 = vector.load %arg10[%c0_16, %c0_17] : memref<1x128xf32, #tpu.memory_space<vmem>>, vector<1x128xf32>
      %31 = vector.broadcast %30 : vector<1x128xf32> to vector<256x128xf32>
      %32 = arith.addf %29, %31 : vector<256x128xf32>
      %33 = arith.truncf %32 : vector<256x128xf32> to vector<256x128xbf16>
      %c0_18 = arith.constant 0 : index
      %c0_19 = arith.constant 0 : index
      %34 = vector.load %arg15[%c0_18, %c0_19] : memref<256x128xbf16, #tpu.memory_space<vmem>>, vector<256x128xbf16>
      tpu.vector_store %arg15[%c0_18, %c0_19], %33 {strides = array<i32>} : memref<256x128xbf16, #tpu.memory_space<vmem>>, vector<256x128xbf16>,
    } else {
    }
    %c0 = arith.constant 0 : index
    %c0_4 = arith.constant 0 : index
    %8 = vector.load %arg4[%c0, %c0_4] : memref<128x256xbf16, #tpu.memory_space<vmem>>, vector<128x256xbf16>
    %c0_5 = arith.constant 0 : index
    %c0_6 = arith.constant 0 : index
    %9 = vector.load %arg15[%c0_5, %c0_6] : memref<256x128xbf16, #tpu.memory_space<vmem>>, vector<256x128xbf16>
    %cst = arith.constant dense<0.000000e+00> : vector<128x128xf32>
    %10 = tpu.matmul %8, %9, %cst {dimension_numbers = #tpu.dot_dimension_numbers<[1], [0], [0], [1], [0, 0, 1, 1], [], []>} : vector<128x256xbf16>, vector<256x128xbf16>, vector<128x128xf32> -> vector<128x128xf32>
    %cst_7 = arith.constant 0.000000e+00 : f32
    %11 = vector.broadcast %cst_7 : f32 to vector<128x128xf32>
    %12 = arith.maximumf %10, %11 : vector<128x128xf32>
    %13 = arith.index_cast %arg0 : i32 to index
    %14 = memref.load %arg2[%13] : memref<3xf32, #tpu.memory_space<smem>>
    %c128_i32 = arith.constant 128 : i32
    %15 = arith.muli %arg1, %c128_i32 : i32
    %16 = tpu.assume_multiple %15, 128 : i32
    %17 = arith.index_cast %16 : i32 to index
    %c0_8 = arith.constant 0 : index
    %18 = vector.load %arg14[%17, %c0_8] : memref<256x128xf32, #tpu.memory_space<vmem>>, vector<128x128xf32>
    %19 = vector.broadcast %14 : f32 to vector<128x128xf32>
    %20 = arith.mulf %19, %12 : vector<128x128xf32>
    %21 = arith.addf %18, %20 : vector<128x128xf32>
    %22 = arith.index_cast %16 : i32 to index
    %c0_9 = arith.constant 0 : index
    %23 = vector.load %arg14[%22, %c0_9] : memref<256x128xf32, #tpu.memory_space<vmem>>, vector<128x128xf32>
    tpu.vector_store %arg14[%22, %c0_9], %21 {strides = array<i32>} : memref<256x128xf32, #tpu.memory_space<vmem>>, vector<128x128xf32>,
    %c2_i32 = arith.constant 2 : i32
    %24 = arith.cmpi eq, %arg0, %c2_i32 : i32
    %25 = arith.extui %24 : i1 to i32
    %c0_i32_10 = arith.constant 0 : i32
    %26 = arith.cmpi ne, %25, %c0_i32_10 : i32
    scf.if %26 {
      %c0_11 = arith.constant 0 : index
      %c0_12 = arith.constant 0 : index
      %27 = vector.load %arg11[%c0_11, %c0_12] : memref<128x128xf32, #tpu.memory_space<vmem>>, vector<128x128xf32>
      %cst_13 = arith.constant dense<0.000000e+00> : vector<128x128xf32>
      %28 = tpu.matmul %21, %27, %cst_13 {dimension_numbers = #tpu.dot_dimension_numbers<[1], [0], [0], [1], [0, 0, 1, 1], [], []>} : vector<128x128xf32>, vector<128x128xf32>, vector<128x128xf32> -> vector<128x128xf32>
      %c0_14 = arith.constant 0 : index
      %c0_15 = arith.constant 0 : index
      %29 = vector.load %arg12[%c0_14, %c0_15] : memref<1x128xf32, #tpu.memory_space<vmem>>, vector<1x128xf32>
      %30 = vector.broadcast %29 : vector<1x128xf32> to vector<128x128xf32>
      %31 = arith.addf %28, %30 : vector<128x128xf32>
      %32 = tpu.iota {dimensions = array<i32: 1>} : vector<128x128xi32>
      %c7_i32 = arith.constant 7 : i32
      %33 = vector.broadcast %c7_i32 : i32 to vector<128x128xi32>
      %34 = arith.cmpi slt, %32, %33 : vector<128x128xi32>
      %cst_16 = arith.constant -1.000000e+30 : f32
      %35 = vector.broadcast %cst_16 : f32 to vector<128x128xf32>
      %36 = arith.select %34, %31, %35 : vector<128x128xi1>, vector<128x128xf32>
      %cst_17 = arith.constant dense<0xFF800000> : vector<128xf32>
      %37 = vector.multi_reduction <maximumf>, %36, %cst_17 [1] : vector<128x128xf32> to vector<128xf32>
      %38 = vector.shape_cast %37 : vector<128xf32> to vector<128x1xf32>
      %39 = vector.broadcast %38 : vector<128x1xf32> to vector<128x128xf32>
      %40 = arith.subf %36, %39 : vector<128x128xf32>
      %41 = math.exp %40 : vector<128x128xf32>
      %cst_18 = arith.constant 0.000000e+00 : f32
      %42 = vector.broadcast %cst_18 : f32 to vector<128x128xf32>
      %43 = arith.select %34, %41, %42 : vector<128x128xi1>, vector<128x128xf32>
      %cst_19 = arith.constant dense<0.000000e+00> : vector<128xf32>
      %44 = vector.multi_reduction <add>, %43, %cst_19 [1] : vector<128x128xf32> to vector<128xf32>
      %45 = vector.shape_cast %44 : vector<128xf32> to vector<128x1xf32>
      %46 = math.log %45 : vector<128x1xf32>
      %47 = vector.broadcast %38 : vector<128x1xf32> to vector<128x128xf32>
      %48 = arith.subf %36, %47 : vector<128x128xf32>
      %49 = vector.broadcast %46 : vector<128x1xf32> to vector<128x128xf32>
      %50 = arith.subf %48, %49 : vector<128x128xf32>
      %c0_20 = arith.constant 0 : index
      %c0_21 = arith.constant 0 : index
      %51 = vector.load %arg13[%c0_20, %c0_21] : memref<128x128xf32, #tpu.memory_space<vmem>>, vector<128x128xf32>
      tpu.vector_store %arg13[%c0_20, %c0_21], %50 {strides = array<i32>} : memref<128x128xf32, #tpu.memory_space<vmem>>, vector<128x128xf32>,
    } else {
    }
    return
  }
  func.func @transform_0(%arg0: i32, %arg1: i32) -> i32 {
    %c0_i32 = arith.constant 0 : i32
    %c0_i32_0 = arith.constant 0 : i32
    return %c0_i32 : i32
  }
  func.func @transform_1(%arg0: i32, %arg1: i32) -> (i32, i32) {
    %c0_i32 = arith.constant 0 : i32
    %c0_i32_0 = arith.constant 0 : i32
    %c0_i32_1 = arith.constant 0 : i32
    return %c0_i32, %c0_i32_0 : i32, i32
  }
  func.func @transform_2(%arg0: i32, %arg1: i32) -> (i32, i32) {
    %c0_i32 = arith.constant 0 : i32
    %c0_i32_0 = arith.constant 0 : i32
    return %arg1, %c0_i32 : i32, i32
  }
  func.func @transform_3(%arg0: i32, %arg1: i32) -> (i32, i32) {
    %c0_i32 = arith.constant 0 : i32
    %c0_i32_0 = arith.constant 0 : i32
    %c0_i32_1 = arith.constant 0 : i32
    return %c0_i32, %c0_i32_0 : i32, i32
  }
  func.func @transform_4(%arg0: i32, %arg1: i32) -> (i32, i32) {
    %c0_i32 = arith.constant 0 : i32
    %c0_i32_0 = arith.constant 0 : i32
    %c0_i32_1 = arith.constant 0 : i32
    return %c0_i32, %c0_i32_0 : i32, i32
  }
  func.func @transform_5(%arg0: i32, %arg1: i32) -> (i32, i32, i32) {
    %c0_i32 = arith.constant 0 : i32
    %c0_i32_0 = arith.constant 0 : i32
    %c0_i32_1 = arith.constant 0 : i32
    %c0_i32_2 = arith.constant 0 : i32
    return %c0_i32, %c0_i32_0, %c0_i32_1 : i32, i32, i32
  }
  func.func @transform_6(%arg0: i32, %arg1: i32) -> (i32, i32, i32) {
    %c0_i32 = arith.constant 0 : i32
    %c0_i32_0 = arith.constant 0 : i32
    %c0_i32_1 = arith.constant 0 : i32
    %c0_i32_2 = arith.constant 0 : i32
    return %c0_i32, %c0_i32_0, %c0_i32_1 : i32, i32, i32
  }
  func.func @transform_7(%arg0: i32, %arg1: i32) -> (i32, i32) {
    %c0_i32 = arith.constant 0 : i32
    %c0_i32_0 = arith.constant 0 : i32
    %c0_i32_1 = arith.constant 0 : i32
    return %c0_i32, %c0_i32_0 : i32, i32
  }
  func.func @transform_8(%arg0: i32, %arg1: i32) -> (i32, i32) {
    %c0_i32 = arith.constant 0 : i32
    %c0_i32_0 = arith.constant 0 : i32
    %c0_i32_1 = arith.constant 0 : i32
    return %c0_i32, %c0_i32_0 : i32, i32
  }
  func.func @transform_9(%arg0: i32, %arg1: i32) -> (i32, i32) {
    %c0_i32 = arith.constant 0 : i32
    %c0_i32_0 = arith.constant 0 : i32
    %c0_i32_1 = arith.constant 0 : i32
    return %c0_i32, %c0_i32_0 : i32, i32
  }
  func.func @transform_10(%arg0: i32, %arg1: i32) -> (i32, i32) {
    %c0_i32 = arith.constant 0 : i32
    %c0_i32_0 = arith.constant 0 : i32
    %c0_i32_1 = arith.constant 0 : i32
    return %c0_i32, %c0_i32_0 : i32, i32
  }
  func.func @transform_11(%arg0: i32, %arg1: i32) -> (i32, i32) {
    %c0_i32 = arith.constant 0 : i32
    %c0_i32_0 = arith.constant 0 : i32
    return %arg1, %c0_i32 : i32, i32
  }
}

</mosaic_0001>

<bundles_post_ra>
// kernel: tpu_custom_call.1
= control target key start
LH: loop header
LB: loop body
LE: loop exit
PB: predicated region body
PF: predicated region fallthrough
CT: control target
= control target key end

     0   :  { %s3774_s0 = inlined_call_operand.hbm [shape: f32[3], index: 0, kind: input, shape index: {}]   ;;  %s3775_s1 = inlined_call_operand.hbm [shape: f32[256,128], index: 1, kind: input, shape index: {}]   ;;  %s3776_s2 = inlined_call_operand.hbm [shape: bf16[256,256], index: 2, kind: input, shape index: {}]   ;;  %s3777_s3 = inlined_call_operand.hbm [shape: f32[128,128], index: 3, kind: input, shape index: {}]   ;;  %s3778_s4 = inlined_call_operand.vmem [shape: f32[1,128], index: 4, kind: input, shape index: {}]   ;;  %s3779_s5 = inlined_call_operand.hbm [shape: f32[1,128,128], index: 5, kind: input, shape index: {}]   ;;  %s3780_s6 = inlined_call_operand.vmem [shape: f32[1,1,128], index: 6, kind: input, shape index: {}]   ;;  %s3781_s7 = inlined_call_operand.hbm [shape: f32[128,128], index: 7, kind: input, shape index: {}]   ;;  %s3782_s8 = inlined_call_operand.vmem [shape: f32[1,128], index: 8, kind: input, shape index: {}]   ;;  %s3783_s9 = inlined_call_operand.hbm [shape: f32[128,128], index: 9, kind: input, shape index: {}]   ;;  %s3784_s10 = inlined_call_operand.vmem [shape: f32[1,128], index: 10, kind: input, shape index: {}]   ;;  %s3785_s11 = inlined_call_operand.hbm [shape: f32[256,128], index: 11, kind: output, shape index: {}]  }
   0x1   :  { %3789 = sst [smem:[#allocation26_spill]] %s3774_s0 }
   0x2   :  { %3790 = sst [smem:[#allocation27_spill]] %s3775_s1 }
   0x3   :  { %3791 = sst [smem:[#allocation28_spill]] %s3777_s3 }
   0x4   :  { %3792 = sst [smem:[#allocation29_spill]] %s3779_s5 }
   0x5   :  { %3793 = sst [smem:[#allocation30_spill]] %s3780_s6 }
   0x6   :  { %3794 = sst [smem:[#allocation31_spill]] %s3781_s7 }
   0x7   :  { %3795 = sst [smem:[#allocation32_spill]] %s3782_s8 }
   0x8   :  { %3796 = sst [smem:[#allocation33_spill]] %s3783_s9 }
   0x9   :  { %3797 = sst [smem:[#allocation34_spill]] %s3784_s10 }
   0xa   :  { %3798 = sst [smem:[#allocation35_spill]] %s3785_s11 }
   0xb   :  { %16 = vsyncpa [#allocation7], 0 }
   0xc   :  { %17 = vsyncpa [#allocation5], 0 }
   0xd   :  { %18 = vsyncpa [#allocation10], 0 }
   0xe   :  { %20 = vsyncpa [#allocation10 + $0x1], 0 }
   0xf   :  { %21 = vsyncpa [#allocation13], 0 }
  0x10   :  { %22 = vsyncpa [#allocation16], 0 }
  0x11   :  { %23 = vsyncpa [#allocation6], 0 }
  0x12   :  { %25 = vsyncpa [#allocation6 + $0x1], 0  ;;  %s3050_s17 = smov 0   ;;  %s3052_s18 = smov 0  }
  0x13   :  { %s3054_s19 = smov 0   ;;  %s3056_s20 = smov 0  }
  0x14   :  { %s3058_s21 = smov 0   ;;  %s3060_s22 = smov 0  }
  0x15   :  { %s3062_s23 = smov 0   ;;  %s3064_s24 = smov 0  }
  0x16 LB: > { %s3091_s25 = sadd.s32 4294967295, %s2978_s24   ;;  %p2023_p0 = scmp.ge.s32.totalorder %s2978_s24, 1  ;;  %s2978_s24 = sphi %s3064_s24, %s31_s24   ;;  %s2974_s23 = sphi %s3062_s23, %s3825_s23   ;;  %s2970_s22 = sphi %s3060_s22, %s3824_s22   ;;  %s2966_s21 = sphi %s3058_s21, %s3823_s21   ;;  %s2962_s20 = sphi %s3056_s20, %s3822_s20   ;;  %s2958_s19 = sphi %s3054_s19, %s3821_s19   ;;  %s2954_s18 = sphi %s3052_s18, %s3820_s18   ;;  %s2950_s17 = sphi %s3050_s17, %s3819_s17  }
  0x17   : > { %p106_p1 = scmp.eq.s32.totalorder %s3091_s25, 0  ;;  %p310_p2 = scmp.lt.s32.totalorder %s2978_s24, 7 }
  0x18   : > { %s3799_s3 = sld [smem:[#allocation28_spill]]  ;;  %s2980_s30 = smov [#allocation11]  }
  0x19   : > { %p3099_p3 = pnand %p2023_p0, %p310_p2  ;;  %s347_s12 = sshll.u32 %s2980_s30, 4  ;;  %s348_s12 = int_to_ptr.vmem [resolvable:$true] %s347_s12 }
  0x1a   : > { %s3801_s5 = sld [smem:[#allocation29_spill]]  ;;  %s2981_s26 = smov [#allocation12]  }
  0x1b   : > { %p2482_p4 = pneg %p3099_p3  ;;  %s364_s27 = sshll.u32 %s2981_s26, 4  ;;  %s365_s27 = int_to_ptr.vmem [resolvable:$true] %s364_s27 }
  0x1c   : > { %s3788_s11 = smov 8   ;;  %s3803_s0 = sld [smem:[#allocation26_spill]] }
  0x1d   : > { %p3110_p5 = pnand %p2482_p4, %p106_p1  ;;  %s3804_s1 = sld [smem:[#allocation27_spill]] }
  0x1e   : > { %s345_s28 = sshll.u32 %s3799_s3, 4  ;;  %s3787_s3 = smov 128   ;;  %s346_s28 = int_to_ptr.hbm [resolvable:$true] %s345_s28 }
  0x1f   : > { %2491 = dma.hbm_to_vmem [thread:$0]  (!%p3110_p5), %s346_s28, 2048, %s348_s12, [#allocation10], %s3787_s3, %s3787_s3, %s3788_s11  }
  0x20   : > { %s362_s15 = sshll.u32 %s3801_s5, 4  ;;  %s2984_s8 = smov [#allocation4]   ;;  %s363_s15 = int_to_ptr.hbm [resolvable:$true] %s362_s15 }
  0x21   : > { %2494 = dma.hbm_to_vmem [thread:$0]  (!%p3110_p5), %s363_s15, 2048, %s365_s27, [#allocation13], %s3787_s3, %s3787_s3, %s3788_s11  }
  0x22   : > { %s322_s14 = sshll.u32 %s3803_s0, 4  ;;  %s2985_s28 = smov [#allocation8]   ;;  %s323_s14 = int_to_ptr.hbm [resolvable:$true] %s322_s14 }
  0x23   : > { %s331_s10 = sshll.u32 %s3804_s1, 4  ;;  %s333_s12 = sshll.u32 %s2985_s28, 4  ;;  %s332_s10 = int_to_ptr.hbm [resolvable:$true] %s331_s10  ;;  %s334_s12 = int_to_ptr.vmem [resolvable:$true] %s333_s12 }
  0x24   : > { %2485 = dma.hbm_to_smem (!%p3110_p5), %s323_s14, 16, %s2984_s8, [#allocation7]  }
  0x25   : > { %s3805_s7 = sld [smem:[#allocation31_spill]]  ;;  %s2986_s13 = smov [#allocation14]  }
  0x26   : > { %2488 = dma.hbm_to_vmem [thread:$0]  (!%p3110_p5), %s332_s10, 4096, %s334_s12, [#allocation5], %s3787_s3, %s3787_s3, %s3788_s11  }
  0x27   : > { %s3806_s9 = sld [smem:[#allocation33_spill]]  ;;  %s381_s6 = sshll.u32 %s2986_s13, 4  ;;  %s382_s6 = int_to_ptr.vmem [resolvable:$true] %s381_s6 }
  0x28   : > { %s2987_s14 = smov [#allocation15]   ;;  %s2022_s26 = sadd.s32 4294967294, %s2978_s24  }
  0x29   : > { %s398_s10 = sshll.u32 %s2987_s14, 4  ;;  %s40_s28 = sadd.s32 1, %s2970_s22  ;;  %s399_s10 = int_to_ptr.vmem [resolvable:$true] %s398_s10 }
  0x2a   : > { %p41_p6 = scmp.ge.s32.totalorder %s40_s28, 2  ;;  %s43_s12 = sadd.s32 1, %s2974_s23 }
  0x2b   : > { %s379_s27 = sshll.u32 %s3805_s7, 4  ;;  %s92_s15 = sadd.s32 1, %s2958_s19  ;;  %s380_s27 = int_to_ptr.hbm [resolvable:$true] %s379_s27 }
  0x2c   : > { %2497 = dma.hbm_to_vmem [thread:$0]  (!%p3110_p5), %s380_s27, 2048, %s382_s6, [#allocation13], %s3787_s3, %s3787_s3, %s3788_s11  }
  0x2d   : > { %s396_s30 = sshll.u32 %s3806_s9, 4  ;;  %p99_p7 = scmp.ne.s32.totalorder %s2958_s19, %s2954_s18  ;;  %s397_s30 = int_to_ptr.hbm [resolvable:$true] %s396_s30 }
  0x2e   : > { %2500 = dma.hbm_to_vmem [thread:$0]  (!%p3110_p5), %s397_s30, 2048, %s399_s10, [#allocation16], %s3787_s3, %s3787_s3, %s3788_s11  }
  0x2f   : > { %s3827_s28 = smov (%p41_p6, %s40_s28), 0  ;;  %s3829_s12 = smov (!%p41_p6, %s43_s12), %s2974_s23 }
  0x30   : > { %s89_s16 = ssub.s32 %s2970_s22, %s3827_s28  ;;  %p100_p8 = scmp.eq.s32.totalorder %s2978_s24, 0 }
  0x31   : > { %p45_p9 = scmp.ge.s32.totalorder %s3829_s12, 3  ;;  %p90_p10 = scmp.eq.s32.totalorder %s89_s16, 0 }
  0x32   : > { %p3168_p11 = por %p100_p8, %p99_p7  ;;  %p105_p12 = scmp.ne.s32.totalorder %s2954_s18, %s2950_s17 }
  0x33   : > { %s3831_s12 = smov (%p45_p9, %s3829_s12), 0  ;;  %p297_p0 = scmp.eq.s32.totalorder %s3091_s25, 5 }
  0x34   : > { %3808 = sst [smem:[#allocation25_spill]] %s3831_s12  ;;  %p3181_p13 = por %p106_p1, %p105_p12 }
  0x35   : > { %s3177_s5 = scalar_select %p90_p10, %s2958_s19, %s92_s15  }
  0x36   : > { %p303_p2 = scmp.eq.s32.totalorder %s2022_s26, 5  ;;  %p2515_p4 = scmp.lt.s32.totalorder %s2978_s24, 6 }
  0x37   : > { %p3190_p5 = por %p297_p0, %p99_p7  ;;  %s415_s13 = sand.u32 1, %s2978_s24  }
  0x38   : > { %p3195_p6 = por %p303_p2, %p105_p12  ;;  %s417_s14 = sand.u32 1, %s2958_s19  }
  0x39   : > { %s2181_s10 = sshll.u32 %s2970_s22, 7  ;;  %s2031_s15 = sshll.u32 %s417_s14, 7 }
  0x3a   : > { %s425_s11 = scalar_lea.hbm %s3776_s2, %s2181_s10  ;;  %s419_s26 = scalar_lea.vmem [#allocation9], %s2031_s15 }
  0x3b   : > { %s426_s0 = sshll.u32 %s425_s11, 4  ;;  %s428_s1 = sshll.u32 %s419_s26, 4  ;;  %s427_s0 = int_to_ptr.hbm [resolvable:$true] %s426_s0  ;;  %s429_s1 = int_to_ptr.vmem [resolvable:$true] %s428_s1 }
  0x3c   : > { %p2502_p7 = pnand %p2515_p4, %p3168_p11  ;;  %s416_s7 = scalar_lea.sflag [#allocation10], %s415_s13 }
  0x3d   : > { %s3812_s9 = smov 8   ;;  %s3813_s12 = smov 128  }
  0x3e   : > { %2504 = dma.hbm_to_vmem [thread:$0]  (!%p2502_p7), %s427_s0, 2048, %s429_s1, %s416_s7, %s3813_s12, %s3813_s12, %s3812_s9  }
  0x3f   : > { %440 = sbr.rel (%p3099_p3) target bundleno = 1474 (0x5c2), region = 64 }
  0x44   : > { %2921 = dma.done.wait (%p106_p1), [#allocation7], 16  }
  0x45   : > { %2923 = vsyncadd (%p106_p1), [#allocation7], 4294967280 }
  0x46   : > { %2925 = dma.done.wait (%p106_p1), [#allocation5], 4096  }
  0x47   : > { %2927 = vsyncadd (%p106_p1), [#allocation5], 4294963200  ;;  %s452_s0 = sand.u32 1, %s3091_s25   ;;  %s454_s1 = sand.u32 1, %s2954_s18  }
  0x48   : > { %s2038_s3 = sshll.u32 %s454_s1, 7  ;;  %s453_s7 = scalar_lea.sflag [#allocation10], %s452_s0 }
  0x49   : > { %s3225_s9 = scalar_lea.vmem [#allocation9], %s2038_s3 }
  0x4a   : > { %2929 = dma.done.wait (%p3181_p13), %s453_s7, 2048  }
  0x4b   : > { %2931 = vsyncadd (%p3181_p13), %s453_s7, 4294965248 }
  0x4c   : > { %2933 = dma.done.wait (%p106_p1), [#allocation10], 2048  }
  0x4d   : > { %2935 = vsyncadd (%p106_p1), [#allocation10], 4294965248 }
  0x4e   : > { %2937 = dma.done.wait (%p106_p1), [#allocation13], 4096  }
  0x4f   : > { %2939 = vsyncadd (%p106_p1), [#allocation13], 4294963200 }
  0x50   : > { %2941 = dma.done.wait (%p106_p1), [#allocation16], 2048  }
  0x51   : > { %2943 = vsyncadd (%p106_p1), [#allocation16], 4294965248 }
  0x52   : > { %482 = sfence }
  0x53   : > { %p519_p3 = scmp.eq.s32.totalorder %s2966_s21, 0  ;;  %p520_p8 = scmp.eq.s32.totalorder %s2962_s20, 0 }
  0x54   : > { %s3245_s11 = scalar_lea.vmem [#allocation17], %s2038_s3 }
  0x55   : > { %p521_p9 = pnand %p520_p8, %p519_p3 }
  0x56   : > { %s3814_s8 = sld [smem:[#allocation30_spill]] (!%p521_p9) }
  0x57   : > { %524 = sbr.rel (%p521_p9) target bundleno = 517 (0x205), region = 96 }
  0x5c   : > { %v572_v0 = vld [vmem:[#allocation11 + $0x78] sm:$0xff]  ;;  %v571_v1 = vld [vmem:[#allocation11 + $0x70] sm:$0xff]  ;;  %v570_v2 = vld [vmem:[#allocation11 + $0x68] sm:$0xff] }
  0x5d   : > { %2310 = vmatpush.msra.mxu2 %v572_v0  ;;  %577 = vmatpush.msra.mxu0 %v572_v0  ;;  %v569_v3 = vld [vmem:[#allocation11 + $0x60] sm:$0xff]  ;;  %v568_v4 = vld [vmem:[#allocation11 + $0x58] sm:$0xff]  ;;  %v567_v5 = vld [vmem:[#allocation11 + $0x50] sm:$0xff] }
  0x5e   : > { %v566_v6 = vld [vmem:[#allocation11 + $0x48] sm:$0xff]  ;;  %v565_v7 = vld [vmem:[#allocation11 + $0x40] sm:$0xff]  ;;  %v564_v8 = vld [vmem:[#allocation11 + $0x38] sm:$0xff] }
  0x5f   : > { %2311 = vmatpush.msra.mxu2 %v571_v1  ;;  %578 = vmatpush.msra.mxu0 %v571_v1  ;;  %v563_v9 = vld [vmem:[#allocation11 + $0x30] sm:$0xff]  ;;  %v562_v10 = vld [vmem:[#allocation11 + $0x28] sm:$0xff]  ;;  %v561_v11 = vld [vmem:[#allocation11 + $0x20] sm:$0xff] }
  0x60   : > { %v560_v12 = vld [vmem:[#allocation11 + $0x18] sm:$0xff]  ;;  %v559_v13 = vld [vmem:[#allocation11 + $0x10] sm:$0xff]  ;;  %v558_v14 = vld [vmem:[#allocation11 + $0x8] sm:$0xff] }
  0x61   : > { %2312 = vmatpush.msra.mxu2 %v570_v2  ;;  %579 = vmatpush.msra.mxu0 %v570_v2  ;;  %v557_v15 = vld [vmem:[#allocation11] sm:$0xff]  ;;  %v542_v18 = vld [vmem:[#allocation8 + $0x88] sm:$0xff]  ;;  %v543_v20 = vld [vmem:[#allocation8 + $0x90] sm:$0xff] }
  0x62   : > { %v541_v16 = vld [vmem:[#allocation8 + $0x80] sm:$0xff]  ;;  %v526_v19 = vld [vmem:[#allocation8 + $0x8] sm:$0xff]  ;;  %v527_v21 = vld [vmem:[#allocation8 + $0x10] sm:$0xff] }
  0x63   : > { %2313 = vmatpush.msra.mxu2 %v569_v3  ;;  %580 = vmatpush.msra.mxu0 %v569_v3  ;;  %v525_v17 = vld [vmem:[#allocation8] sm:$0xff]  ;;  %v544_v22 = vld [vmem:[#allocation8 + $0x98] sm:$0xff]  ;;  %v546_v26 = vld [vmem:[#allocation8 + $0xa8] sm:$0xff] }
  0x64   : > { %v528_v23 = vld [vmem:[#allocation8 + $0x18] sm:$0xff]  ;;  %v545_v24 = vld [vmem:[#allocation8 + $0xa0] sm:$0xff]  ;;  %v530_v27 = vld [vmem:[#allocation8 + $0x28] sm:$0xff] }
  0x65   : > { %2314 = vmatpush.msra.mxu2 %v568_v4  ;;  %581 = vmatpush.msra.mxu0 %v568_v4  ;;  %v529_v25 = vld [vmem:[#allocation8 + $0x20] sm:$0xff]  ;;  %v547_v28 = vld [vmem:[#allocation8 + $0xb0] sm:$0xff]  ;;  %v548_v30 = vld [vmem:[#allocation8 + $0xb8] sm:$0xff] }
  0x66   : > { %v531_v29 = vld [vmem:[#allocation8 + $0x30] sm:$0xff]  ;;  %v532_v31 = vld [vmem:[#allocation8 + $0x38] sm:$0xff]  ;;  %v549_v32 = vld [vmem:[#allocation8 + $0xc0] sm:$0xff] }
  0x67   : > { %2315 = vmatpush.msra.mxu2 %v567_v5  ;;  %582 = vmatpush.msra.mxu0 %v567_v5  ;;  %v533_v33 = vld [vmem:[#allocation8 + $0x40] sm:$0xff]  ;;  %v550_v34 = vld [vmem:[#allocation8 + $0xc8] sm:$0xff]  ;;  %v737_v36 = vld [vmem:[#allocation12 + $0x78] sm:$0xff] }
  0x68   : > { %v534_v35 = vld [vmem:[#allocation8 + $0x48] sm:$0xff]  ;;  %v736_v37 = vld [vmem:[#allocation12 + $0x70] sm:$0xff]  ;;  %2326 = vmatpush.msra.mxu3 %v737_v36  ;;  %742 = vmatpush.msra.mxu1 %v737_v36  ;;  %v734_v39 = vld [vmem:[#allocation12 + $0x60] sm:$0xff] }
  0x69   : > { %2316 = vmatpush.msra.mxu2 %v566_v6  ;;  %583 = vmatpush.msra.mxu0 %v566_v6  ;;  %v735_v38 = vld [vmem:[#allocation12 + $0x68] sm:$0xff]  ;;  %v551_v40 = vld [vmem:[#allocation8 + $0xd0] sm:$0xff]  ;;  %v733_v42 = vld [vmem:[#allocation12 + $0x58] sm:$0xff] }
  0x6a   : > { %2327 = vmatpush.msra.mxu3 %v736_v37  ;;  %743 = vmatpush.msra.mxu1 %v736_v37  ;;  %v535_v41 = vld [vmem:[#allocation8 + $0x50] sm:$0xff]  ;;  %v731_v44 = vld [vmem:[#allocation12 + $0x48] sm:$0xff]  ;;  %v730_v45 = vld [vmem:[#allocation12 + $0x40] sm:$0xff] }
  0x6b   : > { %2317 = vmatpush.msra.mxu2 %v565_v7  ;;  %584 = vmatpush.msra.mxu0 %v565_v7  ;;  %v732_v43 = vld [vmem:[#allocation12 + $0x50] sm:$0xff]  ;;  %v552_v46 = vld [vmem:[#allocation8 + $0xd8] sm:$0xff]  ;;  %v727_v50 = vld [vmem:[#allocation12 + $0x28] sm:$0xff] }
  0x6c   : > { %2328 = vmatpush.msra.mxu3 %v735_v38  ;;  %744 = vmatpush.msra.mxu1 %v735_v38  ;;  %v536_v47 = vld [vmem:[#allocation8 + $0x58] sm:$0xff]  ;;  %v728_v49 = vld [vmem:[#allocation12 + $0x30] sm:$0xff]  ;;  %v726_v51 = vld [vmem:[#allocation12 + $0x20] sm:$0xff] }
  0x6d   : > { %2318 = vmatpush.msra.mxu2 %v564_v8  ;;  %585 = vmatpush.msra.mxu0 %v564_v8  ;;  %v729_v48 = vld [vmem:[#allocation12 + $0x38] sm:$0xff]  ;;  %v553_v52 = vld [vmem:[#allocation8 + $0xe0] sm:$0xff]  ;;  %v724_v55 = vld [vmem:[#allocation12 + $0x10] sm:$0xff] }
  0x6e   : > { %2329 = vmatpush.msra.mxu3 %v734_v39  ;;  %745 = vmatpush.msra.mxu1 %v734_v39  ;;  %v537_v53 = vld [vmem:[#allocation8 + $0x60] sm:$0xff]  ;;  %v725_v54 = vld [vmem:[#allocation12 + $0x18] sm:$0xff]  ;;  %v723_v56 = vld [vmem:[#allocation12 + $0x8] sm:$0xff] }
  0x6f   : > { %2319 = vmatpush.msra.mxu2 %v563_v9  ;;  %586 = vmatpush.msra.mxu0 %v563_v9  ;;  %v554_v57 = vld [vmem:[#allocation8 + $0xe8] sm:$0xff]  ;;  %v722_v59 = vld [vmem:[#allocation12] sm:$0xff]  ;;  %v555_v60 = vld [vmem:[#allocation8 + $0xf0] sm:$0xff] }
  0x70   : > { %2330 = vmatpush.msra.mxu3 %v733_v42  ;;  %746 = vmatpush.msra.mxu1 %v733_v42  ;;  %v538_v58 = vld [vmem:[#allocation8 + $0x68] sm:$0xff]  ;;  %v539_v61 = vld [vmem:[#allocation8 + $0x70] sm:$0xff]  ;;  %v556_v62 = vld [vmem:[#allocation8 + $0xf8] sm:$0xff] }
  0x71   : > { %2320 = vmatpush.msra.mxu2 %v562_v10  ;;  %587 = vmatpush.msra.mxu0 %v562_v10  ;;  %v540_v63 = vld [vmem:[#allocation8 + $0x78] sm:$0xff]  ;;  %v3250_v0 = vld [vmem:[%s3778_s4] ss:$0 sm:$0xff] }
  0x72   : > { %2331 = vmatpush.msra.mxu3 %v732_v43  ;;  %747 = vmatpush.msra.mxu1 %v732_v43 }
  0x73   : > { %2321 = vmatpush.msra.mxu2 %v561_v11  ;;  %588 = vmatpush.msra.mxu0 %v561_v11 }
  0x74   : > { %2332 = vmatpush.msra.mxu3 %v731_v44  ;;  %748 = vmatpush.msra.mxu1 %v731_v44 }
  0x75   : > { %2322 = vmatpush.msra.mxu2 %v560_v12  ;;  %589 = vmatpush.msra.mxu0 %v560_v12 }
  0x76   : > { %2333 = vmatpush.msra.mxu3 %v730_v45  ;;  %749 = vmatpush.msra.mxu1 %v730_v45 }
  0x77   : > { %2323 = vmatpush.msra.mxu2 %v559_v13  ;;  %590 = vmatpush.msra.mxu0 %v559_v13 }
  0x78   : > { %2334 = vmatpush.msra.mxu3 %v729_v48  ;;  %750 = vmatpush.msra.mxu1 %v729_v48 }
  0x79   : > { %2324 = vmatpush.msra.mxu2 %v558_v14  ;;  %591 = vmatpush.msra.mxu0 %v558_v14 }
  0x7a   : > { %2335 = vmatpush.msra.mxu3 %v728_v49  ;;  %751 = vmatpush.msra.mxu1 %v728_v49 }
  0x7b   : > { %2325 = vmatpush.msra.mxu2 %v557_v15  ;;  %592 = vmatpush.msra.mxu0 %v557_v15 }
  0x7c   : > { %641 = vmatmul.f32.vlgmr.msra.gmra.mxu2 %v541_v16  ;;  %593 = vmatmul.f32.vlgmr.msra.gmra.mxu0 %v525_v17 }
  0x7d   : > { %2336 = vmatpush.msra.mxu3 %v727_v50  ;;  %752 = vmatpush.msra.mxu1 %v727_v50 }
  0x7f   : > { %2337 = vmatpush.msra.mxu3 %v726_v51  ;;  %753 = vmatpush.msra.mxu1 %v726_v51 }
  0x81   : > { %2338 = vmatpush.msra.mxu3 %v725_v54  ;;  %754 = vmatpush.msra.mxu1 %v725_v54 }
  0x83   : > { %2339 = vmatpush.msra.mxu3 %v724_v55  ;;  %755 = vmatpush.msra.mxu1 %v724_v55 }
  0x84   : > { %644 = vmatmul.f32.gmra.mxu2 %v542_v18  ;;  %596 = vmatmul.f32.gmra.mxu0 %v526_v19 }
  0x85   : > { %2340 = vmatpush.msra.mxu3 %v723_v56  ;;  %756 = vmatpush.msra.mxu1 %v723_v56 }
  0x87   : > { %2341 = vmatpush.msra.mxu3 %v722_v59  ;;  %757 = vmatpush.msra.mxu1 %v722_v59 }
  0x8c   : > { %647 = vmatmul.f32.gmra.mxu2 %v543_v20  ;;  %599 = vmatmul.f32.gmra.mxu0 %v527_v21 }
  0x94   : > { %650 = vmatmul.f32.gmra.mxu2 %v544_v22  ;;  %602 = vmatmul.f32.gmra.mxu0 %v528_v23 }
  0x9c   : > { %653 = vmatmul.f32.gmra.mxu2 %v545_v24  ;;  %605 = vmatmul.f32.gmra.mxu0 %v529_v25 }
  0xa4   : > { %656 = vmatmul.f32.gmra.mxu2 %v546_v26  ;;  %608 = vmatmul.f32.gmra.mxu0 %v530_v27 }
  0xac   : > { %659 = vmatmul.f32.gmra.mxu2 %v547_v28  ;;  %611 = vmatmul.f32.gmra.mxu0 %v531_v29 }
  0xb4   : > { %662 = vmatmul.f32.gmra.mxu2 %v548_v30  ;;  %614 = vmatmul.f32.gmra.mxu0 %v532_v31 }
  0xbc   : > { %665 = vmatmul.f32.gmra.mxu2 %v549_v32  ;;  %617 = vmatmul.f32.gmra.mxu0 %v533_v33 }
  0xc4   : > { %668 = vmatmul.f32.gmra.mxu2 %v550_v34  ;;  %620 = vmatmul.f32.gmra.mxu0 %v534_v35 }
  0xcc   : > { %671 = vmatmul.f32.gmra.mxu2 %v551_v40  ;;  %623 = vmatmul.f32.gmra.mxu0 %v535_v41 }
  0xd4   : > { %674 = vmatmul.f32.gmra.mxu2 %v552_v46  ;;  %626 = vmatmul.f32.gmra.mxu0 %v536_v47 }
  0xdc   : > { %677 = vmatmul.f32.gmra.mxu2 %v553_v52  ;;  %629 = vmatmul.f32.gmra.mxu0 %v537_v53 }
  0xe4   : > { %680 = vmatmul.f32.gmra.mxu2 %v554_v57  ;;  %632 = vmatmul.f32.gmra.mxu0 %v538_v58 }
  0xec   : > { %683 = vmatmul.f32.gmra.mxu2 %v555_v60  ;;  %635 = vmatmul.f32.gmra.mxu0 %v539_v61 }
  0xf4   : > { %686 = vmatmul.f32.gmra.mxu2 %v556_v62  ;;  %638 = vmatmul.f32.gmra.mxu0 %v540_v63 }
  0xf9   : > { %v594_v1 = vpop.f32.mrf.mxu0 }
  0xfa   : > { %v595_v2 = vadd.f32 %v3250_v0, %v594_v1 }
  0xfc   : > { %v690_v3 = vmax.f32 %v595_v2, 0.0 }
  0xfe   : > { %758 = vmatmul.f32.vlgmr.msra.gmra.mxu1 %v690_v3 }
  0xff   : > { %v642_v4 = vpop.f32.mrf.mxu2 }
 0x100   : > { %v643_v5 = vadd.f32 %v3250_v0, %v642_v4 }
 0x101   : > { %v597_v6 = vpop.f32.mrf.mxu0 }
 0x102   : > { %v706_v7 = vmax.f32 %v643_v5, 0.0  ;;  %v598_v8 = vadd.f32 %v3250_v0, %v597_v6 }
 0x104   : > { %806 = vmatmul.f32.vlgmr.msra.gmra.mxu3 %v706_v7  ;;  %v691_v9 = vmax.f32 %v598_v8, 0.0 }
 0x106   : > { %761 = vmatmul.f32.gmra.mxu1 %v691_v9 }
 0x107   : > { %v645_v10 = vpop.f32.mrf.mxu2 }
 0x108   : > { %v646_v11 = vadd.f32 %v3250_v0, %v645_v10 }
 0x109   : > { %v600_v12 = vpop.f32.mrf.mxu0 }
 0x10a   : > { %v707_v13 = vmax.f32 %v646_v11, 0.0  ;;  %v601_v14 = vadd.f32 %v3250_v0, %v600_v12 }
 0x10c   : > { %809 = vmatmul.f32.gmra.mxu3 %v707_v13  ;;  %v692_v15 = vmax.f32 %v601_v14, 0.0 }
 0x10e   : > { %764 = vmatmul.f32.gmra.mxu1 %v692_v15 }
 0x10f   : > { %v648_v16 = vpop.f32.mrf.mxu2 }
 0x110   : > { %v649_v17 = vadd.f32 %v3250_v0, %v648_v16 }
 0x111   : > { %v603_v18 = vpop.f32.mrf.mxu0 }
 0x112   : > { %v708_v19 = vmax.f32 %v649_v17, 0.0  ;;  %v604_v20 = vadd.f32 %v3250_v0, %v603_v18 }
 0x114   : > { %812 = vmatmul.f32.gmra.mxu3 %v708_v19  ;;  %v693_v21 = vmax.f32 %v604_v20, 0.0 }
 0x116   : > { %767 = vmatmul.f32.gmra.mxu1 %v693_v21 }
 0x117   : > { %v651_v22 = vpop.f32.mrf.mxu2 }
 0x118   : > { %v652_v23 = vadd.f32 %v3250_v0, %v651_v22 }
 0x119   : > { %v606_v24 = vpop.f32.mrf.mxu0 }
 0x11a   : > { %v709_v25 = vmax.f32 %v652_v23, 0.0  ;;  %v607_v26 = vadd.f32 %v3250_v0, %v606_v24 }
 0x11c   : > { %815 = vmatmul.f32.gmra.mxu3 %v709_v25  ;;  %v694_v27 = vmax.f32 %v607_v26, 0.0 }
 0x11e   : > { %770 = vmatmul.f32.gmra.mxu1 %v694_v27 }
 0x11f   : > { %v654_v28 = vpop.f32.mrf.mxu2 }
 0x120   : > { %v655_v29 = vadd.f32 %v3250_v0, %v654_v28 }
 0x121   : > { %v609_v30 = vpop.f32.mrf.mxu0 }
 0x122   : > { %v710_v31 = vmax.f32 %v655_v29, 0.0  ;;  %v610_v32 = vadd.f32 %v3250_v0, %v609_v30 }
 0x124   : > { %818 = vmatmul.f32.gmra.mxu3 %v710_v31  ;;  %v695_v33 = vmax.f32 %v610_v32, 0.0 }
 0x126   : > { %773 = vmatmul.f32.gmra.mxu1 %v695_v33  ;;  %v3287_v33 = vld [vmem:[%s3814_s8] ss:$0 sm:$0xff] }
 0x127   : > { %v657_v34 = vpop.f32.mrf.mxu2 }
 0x128   : > { %v658_v35 = vadd.f32 %v3250_v0, %v657_v34 }
 0x129   : > { %v612_v36 = vpop.f32.mrf.mxu0 }
 0x12a   : > { %v711_v37 = vmax.f32 %v658_v35, 0.0  ;;  %v613_v38 = vadd.f32 %v3250_v0, %v612_v36 }
 0x12c   : > { %821 = vmatmul.f32.gmra.mxu3 %v711_v37  ;;  %v696_v39 = vmax.f32 %v613_v38, 0.0 }
 0x12e   : > { %776 = vmatmul.f32.gmra.mxu1 %v696_v39 }
 0x12f   : > { %v660_v40 = vpop.f32.mrf.mxu2 }
 0x130   : > { %v661_v41 = vadd.f32 %v3250_v0, %v660_v40 }
 0x131   : > { %v615_v42 = vpop.f32.mrf.mxu0 }
 0x132   : > { %v712_v43 = vmax.f32 %v661_v41, 0.0  ;;  %v616_v44 = vadd.f32 %v3250_v0, %v615_v42 }
 0x134   : > { %824 = vmatmul.f32.gmra.mxu3 %v712_v43  ;;  %v697_v45 = vmax.f32 %v616_v44, 0.0 }
 0x136   : > { %779 = vmatmul.f32.gmra.mxu1 %v697_v45 }
 0x137   : > { %v663_v46 = vpop.f32.mrf.mxu2 }
 0x138   : > { %v664_v47 = vadd.f32 %v3250_v0, %v663_v46 }
 0x139   : > { %v618_v48 = vpop.f32.mrf.mxu0 }
 0x13a   : > { %v713_v49 = vmax.f32 %v664_v47, 0.0  ;;  %v619_v50 = vadd.f32 %v3250_v0, %v618_v48 }
 0x13c   : > { %827 = vmatmul.f32.gmra.mxu3 %v713_v49  ;;  %v698_v51 = vmax.f32 %v619_v50, 0.0 }
 0x13e   : > { %782 = vmatmul.f32.gmra.mxu1 %v698_v51 }
 0x13f   : > { %v666_v52 = vpop.f32.mrf.mxu2 }
 0x140   : > { %v667_v53 = vadd.f32 %v3250_v0, %v666_v52 }
 0x141   : > { %v621_v54 = vpop.f32.mrf.mxu0 }
 0x142   : > { %v714_v55 = vmax.f32 %v667_v53, 0.0  ;;  %v622_v56 = vadd.f32 %v3250_v0, %v621_v54 }
 0x144   : > { %830 = vmatmul.f32.gmra.mxu3 %v714_v55  ;;  %v699_v57 = vmax.f32 %v622_v56, 0.0 }
 0x146   : > { %785 = vmatmul.f32.gmra.mxu1 %v699_v57 }
 0x147   : > { %v669_v58 = vpop.f32.mrf.mxu2 }
 0x148   : > { %v670_v59 = vadd.f32 %v3250_v0, %v669_v58 }
 0x149   : > { %v624_v60 = vpop.f32.mrf.mxu0 }
 0x14a   : > { %v715_v61 = vmax.f32 %v670_v59, 0.0  ;;  %v625_v62 = vadd.f32 %v3250_v0, %v624_v60 }
 0x14c   : > { %833 = vmatmul.f32.gmra.mxu3 %v715_v61  ;;  %v700_v63 = vmax.f32 %v625_v62, 0.0 }
 0x14e   : > { %788 = vmatmul.f32.gmra.mxu1 %v700_v63 }
 0x14f   : > { %v672_v1 = vpop.f32.mrf.mxu2 }
 0x150   : > { %v673_v2 = vadd.f32 %v3250_v0, %v672_v1 }
 0x151   : > { %v627_v3 = vpop.f32.mrf.mxu0 }
 0x152   : > { %v716_v4 = vmax.f32 %v673_v2, 0.0  ;;  %v628_v5 = vadd.f32 %v3250_v0, %v627_v3 }
 0x154   : > { %836 = vmatmul.f32.gmra.mxu3 %v716_v4  ;;  %v701_v6 = vmax.f32 %v628_v5, 0.0 }
 0x156   : > { %791 = vmatmul.f32.gmra.mxu1 %v701_v6 }
 0x157   : > { %v675_v7 = vpop.f32.mrf.mxu2 }
 0x158   : > { %v676_v8 = vadd.f32 %v3250_v0, %v675_v7 }
 0x159   : > { %v630_v9 = vpop.f32.mrf.mxu0 }
 0x15a   : > { %v717_v10 = vmax.f32 %v676_v8, 0.0  ;;  %v631_v11 = vadd.f32 %v3250_v0, %v630_v9 }
 0x15c   : > { %839 = vmatmul.f32.gmra.mxu3 %v717_v10  ;;  %v702_v12 = vmax.f32 %v631_v11, 0.0 }
 0x15e   : > { %794 = vmatmul.f32.gmra.mxu1 %v702_v12 }
 0x15f   : > { %v678_v13 = vpop.f32.mrf.mxu2 }
 0x160   : > { %v679_v14 = vadd.f32 %v3250_v0, %v678_v13 }
 0x161   : > { %v633_v15 = vpop.f32.mrf.mxu0 }
 0x162   : > { %v718_v16 = vmax.f32 %v679_v14, 0.0  ;;  %v634_v17 = vadd.f32 %v3250_v0, %v633_v15 }
 0x164   : > { %842 = vmatmul.f32.gmra.mxu3 %v718_v16  ;;  %v703_v18 = vmax.f32 %v634_v17, 0.0 }
 0x166   : > { %797 = vmatmul.f32.gmra.mxu1 %v703_v18 }
 0x167   : > { %v681_v19 = vpop.f32.mrf.mxu2 }
 0x168   : > { %v682_v20 = vadd.f32 %v3250_v0, %v681_v19 }
 0x169   : > { %v636_v21 = vpop.f32.mrf.mxu0 }
 0x16a   : > { %v719_v22 = vmax.f32 %v682_v20, 0.0  ;;  %v637_v23 = vadd.f32 %v3250_v0, %v636_v21 }
 0x16c   : > { %845 = vmatmul.f32.gmra.mxu3 %v719_v22  ;;  %v704_v24 = vmax.f32 %v637_v23, 0.0 }
 0x16e   : > { %800 = vmatmul.f32.gmra.mxu1 %v704_v24 }
 0x16f   : > { %v684_v25 = vpop.f32.mrf.mxu2 }
 0x170   : > { %v685_v26 = vadd.f32 %v3250_v0, %v684_v25 }
 0x171   : > { %v639_v27 = vpop.f32.mrf.mxu0 }
 0x172   : > { %v720_v28 = vmax.f32 %v685_v26, 0.0  ;;  %v640_v29 = vadd.f32 %v3250_v0, %v639_v27 }
 0x174   : > { %848 = vmatmul.f32.gmra.mxu3 %v720_v28  ;;  %v705_v30 = vmax.f32 %v640_v29, 0.0 }
 0x176   : > { %803 = vmatmul.f32.gmra.mxu1 %v705_v30 }
 0x177   : > { %v687_v31 = vpop.f32.mrf.mxu2 }
 0x178   : > { %v688_v32 = vadd.f32 %v3250_v0, %v687_v31 }
 0x17a   : > { %v721_v34 = vmax.f32 %v688_v32, 0.0 }
 0x17b   : > { %v759_v35 = vpop.f32.mrf.mxu1 }
 0x17c   : > { %851 = vmatmul.f32.gmra.mxu3 %v721_v34  ;;  %v760_v36 = vadd.f32 %v3287_v33, %v759_v35 }
 0x17e   : > { %v855_v37 = vmax.f32 %v760_v36, 0.0 }
 0x180   : > { %887 = vst [vmem:[#allocation2] sm:$0xff] %v855_v37 }
 0x183   : > { %v762_v38 = vpop.f32.mrf.mxu1 }
 0x184   : > { %v763_v39 = vadd.f32 %v3287_v33, %v762_v38 }
 0x186   : > { %v856_v40 = vmax.f32 %v763_v39, 0.0 }
 0x187   : > { %v807_v41 = vpop.f32.mrf.mxu3 }
 0x188   : > { %v808_v42 = vadd.f32 %v3287_v33, %v807_v41  ;;  %888 = vst [vmem:[#allocation2 + $0x8] sm:$0xff] %v856_v40 }
 0x18a   : > { %v871_v0 = vmax.f32 %v808_v42, 0.0 }
 0x18b   : > { %v765_v43 = vpop.f32.mrf.mxu1 }
 0x18c   : > { %903 = vst [vmem:[#allocation2 + $0x80] sm:$0xff] %v871_v0  ;;  %v766_v44 = vadd.f32 %v3287_v33, %v765_v43 }
 0x18e   : > { %v857_v45 = vmax.f32 %v766_v44, 0.0 }
 0x18f   : > { %v810_v46 = vpop.f32.mrf.mxu3 }
 0x190   : > { %v811_v47 = vadd.f32 %v3287_v33, %v810_v46  ;;  %889 = vst [vmem:[#allocation2 + $0x10] sm:$0xff] %v857_v45 }
 0x192   : > { %v872_v48 = vmax.f32 %v811_v47, 0.0 }
 0x193   : > { %v768_v49 = vpop.f32.mrf.mxu1 }
 0x194   : > { %904 = vst [vmem:[#allocation2 + $0x88] sm:$0xff] %v872_v48  ;;  %v769_v50 = vadd.f32 %v3287_v33, %v768_v49 }
 0x196   : > { %v858_v51 = vmax.f32 %v769_v50, 0.0 }
 0x197   : > { %v813_v52 = vpop.f32.mrf.mxu3 }
 0x198   : > { %v814_v53 = vadd.f32 %v3287_v33, %v813_v52  ;;  %890 = vst [vmem:[#allocation2 + $0x18] sm:$0xff] %v858_v51 }
 0x19a   : > { %v873_v54 = vmax.f32 %v814_v53, 0.0 }
 0x19b   : > { %v771_v55 = vpop.f32.mrf.mxu1 }
 0x19c   : > { %905 = vst [vmem:[#allocation2 + $0x90] sm:$0xff] %v873_v54  ;;  %v772_v56 = vadd.f32 %v3287_v33, %v771_v55 }
 0x19e   : > { %v859_v57 = vmax.f32 %v772_v56, 0.0 }
 0x19f   : > { %v816_v58 = vpop.f32.mrf.mxu3 }
 0x1a0   : > { %v817_v59 = vadd.f32 %v3287_v33, %v816_v58  ;;  %891 = vst [vmem:[#allocation2 + $0x20] sm:$0xff] %v859_v57 }
 0x1a2   : > { %v874_v60 = vmax.f32 %v817_v59, 0.0 }
 0x1a3   : > { %v774_v61 = vpop.f32.mrf.mxu1 }
 0x1a4   : > { %906 = vst [vmem:[#allocation2 + $0x98] sm:$0xff] %v874_v60  ;;  %v775_v62 = vadd.f32 %v3287_v33, %v774_v61 }
 0x1a6   : > { %v860_v63 = vmax.f32 %v775_v62, 0.0 }
 0x1a7   : > { %v819_v1 = vpop.f32.mrf.mxu3 }
 0x1a8   : > { %v820_v2 = vadd.f32 %v3287_v33, %v819_v1  ;;  %892 = vst [vmem:[#allocation2 + $0x28] sm:$0xff] %v860_v63 }
 0x1aa   : > { %v875_v3 = vmax.f32 %v820_v2, 0.0 }
 0x1ab   : > { %v777_v4 = vpop.f32.mrf.mxu1 }
 0x1ac   : > { %907 = vst [vmem:[#allocation2 + $0xa0] sm:$0xff] %v875_v3  ;;  %v778_v5 = vadd.f32 %v3287_v33, %v777_v4 }
 0x1ae   : > { %v861_v6 = vmax.f32 %v778_v5, 0.0 }
 0x1af   : > { %v822_v7 = vpop.f32.mrf.mxu3 }
 0x1b0   : > { %v823_v8 = vadd.f32 %v3287_v33, %v822_v7  ;;  %893 = vst [vmem:[#allocation2 + $0x30] sm:$0xff] %v861_v6 }
 0x1b2   : > { %v876_v9 = vmax.f32 %v823_v8, 0.0 }
 0x1b3   : > { %v780_v10 = vpop.f32.mrf.mxu1 }
 0x1b4   : > { %908 = vst [vmem:[#allocation2 + $0xa8] sm:$0xff] %v876_v9  ;;  %v781_v11 = vadd.f32 %v3287_v33, %v780_v10 }
 0x1b6   : > { %v862_v12 = vmax.f32 %v781_v11, 0.0 }
 0x1b7   : > { %v825_v13 = vpop.f32.mrf.mxu3 }
 0x1b8   : > { %v826_v14 = vadd.f32 %v3287_v33, %v825_v13  ;;  %894 = vst [vmem:[#allocation2 + $0x38] sm:$0xff] %v862_v12 }
 0x1ba   : > { %v877_v15 = vmax.f32 %v826_v14, 0.0 }
 0x1bb   : > { %v783_v16 = vpop.f32.mrf.mxu1 }
 0x1bc   : > { %909 = vst [vmem:[#allocation2 + $0xb0] sm:$0xff] %v877_v15  ;;  %v784_v17 = vadd.f32 %v3287_v33, %v783_v16 }
 0x1be   : > { %v863_v18 = vmax.f32 %v784_v17, 0.0 }
 0x1bf   : > { %v828_v19 = vpop.f32.mrf.mxu3 }
 0x1c0   : > { %v829_v20 = vadd.f32 %v3287_v33, %v828_v19  ;;  %895 = vst [vmem:[#allocation2 + $0x40] sm:$0xff] %v863_v18 }
 0x1c2   : > { %v878_v21 = vmax.f32 %v829_v20, 0.0 }
 0x1c3   : > { %v786_v22 = vpop.f32.mrf.mxu1 }
 0x1c4   : > { %910 = vst [vmem:[#allocation2 + $0xb8] sm:$0xff] %v878_v21  ;;  %v787_v23 = vadd.f32 %v3287_v33, %v786_v22 }
 0x1c6   : > { %v864_v24 = vmax.f32 %v787_v23, 0.0 }
 0x1c7   : > { %v831_v25 = vpop.f32.mrf.mxu3 }
 0x1c8   : > { %v832_v26 = vadd.f32 %v3287_v33, %v831_v25  ;;  %896 = vst [vmem:[#allocation2 + $0x48] sm:$0xff] %v864_v24 }
 0x1ca   : > { %v879_v27 = vmax.f32 %v832_v26, 0.0 }
 0x1cb   : > { %v789_v28 = vpop.f32.mrf.mxu1 }
 0x1cc   : > { %911 = vst [vmem:[#allocation2 + $0xc0] sm:$0xff] %v879_v27  ;;  %v790_v29 = vadd.f32 %v3287_v33, %v789_v28 }
 0x1ce   : > { %v865_v30 = vmax.f32 %v790_v29, 0.0 }
 0x1cf   : > { %v834_v31 = vpop.f32.mrf.mxu3 }
 0x1d0   : > { %v835_v32 = vadd.f32 %v3287_v33, %v834_v31  ;;  %897 = vst [vmem:[#allocation2 + $0x50] sm:$0xff] %v865_v30 }
 0x1d2   : > { %v880_v34 = vmax.f32 %v835_v32, 0.0 }
 0x1d3   : > { %v792_v35 = vpop.f32.mrf.mxu1 }
 0x1d4   : > { %912 = vst [vmem:[#allocation2 + $0xc8] sm:$0xff] %v880_v34  ;;  %v793_v36 = vadd.f32 %v3287_v33, %v792_v35 }
 0x1d6   : > { %v866_v37 = vmax.f32 %v793_v36, 0.0 }
 0x1d7   : > { %v837_v38 = vpop.f32.mrf.mxu3 }
 0x1d8   : > { %v838_v39 = vadd.f32 %v3287_v33, %v837_v38  ;;  %898 = vst [vmem:[#allocation2 + $0x58] sm:$0xff] %v866_v37 }
 0x1da   : > { %v881_v40 = vmax.f32 %v838_v39, 0.0 }
 0x1db   : > { %v795_v41 = vpop.f32.mrf.mxu1 }
 0x1dc   : > { %913 = vst [vmem:[#allocation2 + $0xd0] sm:$0xff] %v881_v40  ;;  %v796_v42 = vadd.f32 %v3287_v33, %v795_v41 }
 0x1de   : > { %v867_v0 = vmax.f32 %v796_v42, 0.0 }
 0x1df   : > { %v840_v43 = vpop.f32.mrf.mxu3 }
 0x1e0   : > { %v841_v44 = vadd.f32 %v3287_v33, %v840_v43  ;;  %899 = vst [vmem:[#allocation2 + $0x60] sm:$0xff] %v867_v0 }
 0x1e2   : > { %v882_v45 = vmax.f32 %v841_v44, 0.0 }
 0x1e3   : > { %v798_v46 = vpop.f32.mrf.mxu1 }
 0x1e4   : > { %914 = vst [vmem:[#allocation2 + $0xd8] sm:$0xff] %v882_v45  ;;  %v799_v47 = vadd.f32 %v3287_v33, %v798_v46 }
 0x1e6   : > { %v868_v48 = vmax.f32 %v799_v47, 0.0 }
 0x1e7   : > { %v843_v49 = vpop.f32.mrf.mxu3 }
 0x1e8   : > { %v844_v50 = vadd.f32 %v3287_v33, %v843_v49  ;;  %900 = vst [vmem:[#allocation2 + $0x68] sm:$0xff] %v868_v48 }
 0x1ea   : > { %v883_v51 = vmax.f32 %v844_v50, 0.0 }
 0x1eb   : > { %v801_v52 = vpop.f32.mrf.mxu1 }
 0x1ec   : > { %915 = vst [vmem:[#allocation2 + $0xe0] sm:$0xff] %v883_v51  ;;  %v802_v53 = vadd.f32 %v3287_v33, %v801_v52 }
 0x1ee   : > { %v869_v54 = vmax.f32 %v802_v53, 0.0 }
 0x1ef   : > { %v846_v55 = vpop.f32.mrf.mxu3 }
 0x1f0   : > { %v847_v56 = vadd.f32 %v3287_v33, %v846_v55  ;;  %901 = vst [vmem:[#allocation2 + $0x70] sm:$0xff] %v869_v54 }
 0x1f2   : > { %v884_v57 = vmax.f32 %v847_v56, 0.0 }
 0x1f3   : > { %v804_v58 = vpop.f32.mrf.mxu1 }
 0x1f4   : > { %916 = vst [vmem:[#allocation2 + $0xe8] sm:$0xff] %v884_v57  ;;  %v805_v59 = vadd.f32 %v3287_v33, %v804_v58 }
 0x1f6   : > { %v870_v60 = vmax.f32 %v805_v59, 0.0 }
 0x1f7   : > { %v849_v61 = vpop.f32.mrf.mxu3 }
 0x1f8   : > { %v850_v62 = vadd.f32 %v3287_v33, %v849_v61  ;;  %902 = vst [vmem:[#allocation2 + $0x78] sm:$0xff] %v870_v60 }
 0x1fa   : > { %v885_v63 = vmax.f32 %v850_v62, 0.0 }
 0x1fc   : > { %917 = vst [vmem:[#allocation2 + $0xf0] sm:$0xff] %v885_v63 }
 0x1ff   : > { %v852_v1 = vpop.f32.mrf.mxu3 }
 0x200   : > { %v853_v2 = vadd.f32 %v3287_v33, %v852_v1 }
 0x202   : > { %v886_v3 = vmax.f32 %v853_v2, 0.0 }
 0x204   : > { %918 = vst [vmem:[#allocation2 + $0xf8] sm:$0xff] %v886_v3 }
 0x205 PF: > { %p2044_p1 = scmp.ne.s32.totalorder %s2962_s20, 0 }
 0x206   : > { %s3815_s10 = sld [smem:[#allocation32_spill]] (!%p2044_p1) }
 0x207   : > { %921 = sbr.rel (%p2044_p1) target bundleno = 752 (0x2f0), region = 100 }
 0x20c   : > { %v969_v4 = vld [vmem:[#allocation14 + $0x78] sm:$0xff]  ;;  %v968_v5 = vld [vmem:[#allocation14 + $0x70] sm:$0xff]  ;;  %v967_v6 = vld [vmem:[#allocation14 + $0x68] sm:$0xff] }
 0x20d   : > { %974 = vmatpush.msra.mxu0 %v969_v4  ;;  %2342 = vmatpush.msra.mxu1 %v969_v4  ;;  %v966_v7 = vld [vmem:[#allocation14 + $0x60] sm:$0xff]  ;;  %v965_v33 = vld [vmem:[#allocation14 + $0x58] sm:$0xff]  ;;  %v964_v8 = vld [vmem:[#allocation14 + $0x50] sm:$0xff] }
 0x20e   : > { %2343 = vmatpush.msra.mxu2 %v969_v4  ;;  %2344 = vmatpush.msra.mxu3 %v969_v4  ;;  %v963_v9 = vld [vmem:[#allocation14 + $0x48] sm:$0xff]  ;;  %v962_v10 = vld [vmem:[#allocation14 + $0x40] sm:$0xff]  ;;  %v961_v11 = vld [vmem:[#allocation14 + $0x38] sm:$0xff] }
 0x20f   : > { %975 = vmatpush.msra.mxu0 %v968_v5  ;;  %2345 = vmatpush.msra.mxu1 %v968_v5  ;;  %v960_v12 = vld [vmem:[#allocation14 + $0x30] sm:$0xff]  ;;  %v959_v13 = vld [vmem:[#allocation14 + $0x28] sm:$0xff]  ;;  %v958_v14 = vld [vmem:[#allocation14 + $0x20] sm:$0xff] }
 0x210   : > { %2346 = vmatpush.msra.mxu2 %v968_v5  ;;  %2347 = vmatpush.msra.mxu3 %v968_v5  ;;  %v957_v15 = vld [vmem:[#allocation14 + $0x18] sm:$0xff]  ;;  %v956_v16 = vld [vmem:[#allocation14 + $0x10] sm:$0xff]  ;;  %v955_v17 = vld [vmem:[#allocation14 + $0x8] sm:$0xff] }
 0x211   : > { %976 = vmatpush.msra.mxu0 %v967_v6  ;;  %2348 = vmatpush.msra.mxu1 %v967_v6  ;;  %v954_v18 = vld [vmem:[#allocation14] sm:$0xff]  ;;  %v923_v23 = vld [vmem:[#allocation2 + $0x8] sm:$0xff]  ;;  %v924_v27 = vld [vmem:[#allocation2 + $0x10] sm:$0xff] }
 0x212   : > { %2349 = vmatpush.msra.mxu2 %v967_v6  ;;  %2350 = vmatpush.msra.mxu3 %v967_v6  ;;  %v922_v19 = vld [vmem:[#allocation2] sm:$0xff]  ;;  %v931_v24 = vld [vmem:[#allocation2 + $0x48] sm:$0xff]  ;;  %v932_v28 = vld [vmem:[#allocation2 + $0x50] sm:$0xff] }
 0x213   : > { %977 = vmatpush.msra.mxu0 %v966_v7  ;;  %2351 = vmatpush.msra.mxu1 %v966_v7  ;;  %v930_v20 = vld [vmem:[#allocation2 + $0x40] sm:$0xff]  ;;  %v939_v25 = vld [vmem:[#allocation2 + $0x88] sm:$0xff]  ;;  %v940_v29 = vld [vmem:[#allocation2 + $0x90] sm:$0xff] }
 0x214   : > { %2352 = vmatpush.msra.mxu2 %v966_v7  ;;  %2353 = vmatpush.msra.mxu3 %v966_v7  ;;  %v938_v21 = vld [vmem:[#allocation2 + $0x80] sm:$0xff]  ;;  %v947_v26 = vld [vmem:[#allocation2 + $0xc8] sm:$0xff]  ;;  %v948_v30 = vld [vmem:[#allocation2 + $0xd0] sm:$0xff] }
 0x215   : > { %978 = vmatpush.msra.mxu0 %v965_v33  ;;  %2354 = vmatpush.msra.mxu1 %v965_v33  ;;  %v946_v22 = vld [vmem:[#allocation2 + $0xc0] sm:$0xff]  ;;  %v925_v31 = vld [vmem:[#allocation2 + $0x18] sm:$0xff]  ;;  %v927_v40 = vld [vmem:[#allocation2 + $0x28] sm:$0xff] }
 0x216   : > { %2355 = vmatpush.msra.mxu2 %v965_v33  ;;  %2356 = vmatpush.msra.mxu3 %v965_v33  ;;  %v933_v32 = vld [vmem:[#allocation2 + $0x58] sm:$0xff]  ;;  %v926_v36 = vld [vmem:[#allocation2 + $0x20] sm:$0xff]  ;;  %v935_v41 = vld [vmem:[#allocation2 + $0x68] sm:$0xff] }
 0x217   : > { %979 = vmatpush.msra.mxu0 %v964_v8  ;;  %2357 = vmatpush.msra.mxu1 %v964_v8  ;;  %v941_v34 = vld [vmem:[#allocation2 + $0x98] sm:$0xff]  ;;  %v934_v37 = vld [vmem:[#allocation2 + $0x60] sm:$0xff]  ;;  %v943_v42 = vld [vmem:[#allocation2 + $0xa8] sm:$0xff] }
 0x218   : > { %2358 = vmatpush.msra.mxu2 %v964_v8  ;;  %2359 = vmatpush.msra.mxu3 %v964_v8  ;;  %v949_v35 = vld [vmem:[#allocation2 + $0xd8] sm:$0xff]  ;;  %v942_v38 = vld [vmem:[#allocation2 + $0xa0] sm:$0xff]  ;;  %v951_v0 = vld [vmem:[#allocation2 + $0xe8] sm:$0xff] }
 0x219   : > { %980 = vmatpush.msra.mxu0 %v963_v9  ;;  %2360 = vmatpush.msra.mxu1 %v963_v9  ;;  %v950_v39 = vld [vmem:[#allocation2 + $0xe0] sm:$0xff]  ;;  %v928_v43 = vld [vmem:[#allocation2 + $0x30] sm:$0xff]  ;;  %v929_v47 = vld [vmem:[#allocation2 + $0x38] sm:$0xff] }
 0x21a   : > { %2361 = vmatpush.msra.mxu2 %v963_v9  ;;  %2362 = vmatpush.msra.mxu3 %v963_v9  ;;  %v936_v44 = vld [vmem:[#allocation2 + $0x70] sm:$0xff]  ;;  %v937_v48 = vld [vmem:[#allocation2 + $0x78] sm:$0xff]  ;;  %v3325_v53 = vld [vmem:[%s3815_s10] ss:$0 sm:$0xff] }
 0x21b   : > { %981 = vmatpush.msra.mxu0 %v962_v10  ;;  %2363 = vmatpush.msra.mxu1 %v962_v10  ;;  %v944_v45 = vld [vmem:[#allocation2 + $0xb0] sm:$0xff]  ;;  %v945_v49 = vld [vmem:[#allocation2 + $0xb8] sm:$0xff] }
 0x21c   : > { %2364 = vmatpush.msra.mxu2 %v962_v10  ;;  %2365 = vmatpush.msra.mxu3 %v962_v10  ;;  %v952_v46 = vld [vmem:[#allocation2 + $0xf0] sm:$0xff]  ;;  %v953_v50 = vld [vmem:[#allocation2 + $0xf8] sm:$0xff] }
 0x21d   : > { %982 = vmatpush.msra.mxu0 %v961_v11  ;;  %2366 = vmatpush.msra.mxu1 %v961_v11 }
 0x21e   : > { %2367 = vmatpush.msra.mxu2 %v961_v11  ;;  %2368 = vmatpush.msra.mxu3 %v961_v11 }
 0x21f   : > { %983 = vmatpush.msra.mxu0 %v960_v12  ;;  %2369 = vmatpush.msra.mxu1 %v960_v12 }
 0x220   : > { %2370 = vmatpush.msra.mxu2 %v960_v12  ;;  %2371 = vmatpush.msra.mxu3 %v960_v12 }
 0x221   : > { %984 = vmatpush.msra.mxu0 %v959_v13  ;;  %2372 = vmatpush.msra.mxu1 %v959_v13 }
 0x222   : > { %2373 = vmatpush.msra.mxu2 %v959_v13  ;;  %2374 = vmatpush.msra.mxu3 %v959_v13 }
 0x223   : > { %985 = vmatpush.msra.mxu0 %v958_v14  ;;  %2375 = vmatpush.msra.mxu1 %v958_v14 }
 0x224   : > { %2376 = vmatpush.msra.mxu2 %v958_v14  ;;  %2377 = vmatpush.msra.mxu3 %v958_v14 }
 0x225   : > { %986 = vmatpush.msra.mxu0 %v957_v15  ;;  %2378 = vmatpush.msra.mxu1 %v957_v15 }
 0x226   : > { %2379 = vmatpush.msra.mxu2 %v957_v15  ;;  %2380 = vmatpush.msra.mxu3 %v957_v15 }
 0x227   : > { %987 = vmatpush.msra.mxu0 %v956_v16  ;;  %2381 = vmatpush.msra.mxu1 %v956_v16 }
 0x228   : > { %2382 = vmatpush.msra.mxu2 %v956_v16  ;;  %2383 = vmatpush.msra.mxu3 %v956_v16 }
 0x229   : > { %988 = vmatpush.msra.mxu0 %v955_v17  ;;  %2384 = vmatpush.msra.mxu1 %v955_v17 }
 0x22a   : > { %2385 = vmatpush.msra.mxu2 %v955_v17  ;;  %2386 = vmatpush.msra.mxu3 %v955_v17 }
 0x22b   : > { %989 = vmatpush.msra.mxu0 %v954_v18  ;;  %2387 = vmatpush.msra.mxu1 %v954_v18 }
 0x22c   : > { %2388 = vmatpush.msra.mxu2 %v954_v18  ;;  %2389 = vmatpush.msra.mxu3 %v954_v18 }
 0x22d   : > { %990 = vmatmul.f32.vlgmr.msra.gmra.mxu0 %v922_v19  ;;  %1014 = vmatmul.f32.vlgmr.msra.gmra.mxu1 %v930_v20 }
 0x22e   : > { %1038 = vmatmul.f32.vlgmr.msra.gmra.mxu2 %v938_v21  ;;  %1062 = vmatmul.f32.vlgmr.msra.gmra.mxu3 %v946_v22 }
 0x235   : > { %993 = vmatmul.f32.gmra.mxu0 %v923_v23  ;;  %1017 = vmatmul.f32.gmra.mxu1 %v931_v24 }
 0x236   : > { %1041 = vmatmul.f32.gmra.mxu2 %v939_v25  ;;  %1065 = vmatmul.f32.gmra.mxu3 %v947_v26 }
 0x23d   : > { %996 = vmatmul.f32.gmra.mxu0 %v924_v27  ;;  %1020 = vmatmul.f32.gmra.mxu1 %v932_v28 }
 0x23e   : > { %1044 = vmatmul.f32.gmra.mxu2 %v940_v29  ;;  %1068 = vmatmul.f32.gmra.mxu3 %v948_v30 }
 0x245   : > { %999 = vmatmul.f32.gmra.mxu0 %v925_v31  ;;  %1023 = vmatmul.f32.gmra.mxu1 %v933_v32 }
 0x246   : > { %1047 = vmatmul.f32.gmra.mxu2 %v941_v34  ;;  %1071 = vmatmul.f32.gmra.mxu3 %v949_v35 }
 0x24d   : > { %1002 = vmatmul.f32.gmra.mxu0 %v926_v36  ;;  %1026 = vmatmul.f32.gmra.mxu1 %v934_v37 }
 0x24e   : > { %1050 = vmatmul.f32.gmra.mxu2 %v942_v38  ;;  %1074 = vmatmul.f32.gmra.mxu3 %v950_v39 }
 0x255   : > { %1005 = vmatmul.f32.gmra.mxu0 %v927_v40  ;;  %1029 = vmatmul.f32.gmra.mxu1 %v935_v41 }
 0x256   : > { %1053 = vmatmul.f32.gmra.mxu2 %v943_v42  ;;  %1077 = vmatmul.f32.gmra.mxu3 %v951_v0 }
 0x25d   : > { %1008 = vmatmul.f32.gmra.mxu0 %v928_v43  ;;  %1032 = vmatmul.f32.gmra.mxu1 %v936_v44 }
 0x25e   : > { %1056 = vmatmul.f32.gmra.mxu2 %v944_v45  ;;  %1080 = vmatmul.f32.gmra.mxu3 %v952_v46 }
 0x265   : > { %1011 = vmatmul.f32.gmra.mxu0 %v929_v47  ;;  %1035 = vmatmul.f32.gmra.mxu1 %v937_v48 }
 0x266   : > { %1059 = vmatmul.f32.gmra.mxu2 %v945_v49  ;;  %1083 = vmatmul.f32.gmra.mxu3 %v953_v50 }
 0x2aa   : > { %v991_v51 = vpop.f32.mrf.mxu0  ;;  %v1015_v52 = vpop.f32.mrf.mxu1 }
 0x2ab   : > { %v992_v58 = vadd.f32 %v3325_v53, %v991_v51  ;;  %v1016_v59 = vadd.f32 %v3325_v53, %v1015_v52 }
 0x2b1   : > { %v1039_v54 = vpop.f32.mrf.mxu2  ;;  %v1063_v55 = vpop.f32.mrf.mxu3 }
 0x2b2   : > { %v994_v56 = vpop.f32.mrf.mxu0  ;;  %v1018_v57 = vpop.f32.mrf.mxu1  ;;  %v1040_v3 = vadd.f32 %v3325_v53, %v1039_v54  ;;  %v1064_v4 = vadd.f32 %v3325_v53, %v1063_v55 }
 0x2b3   : > { %v995_v60 = vadd.f32 %v3325_v53, %v994_v56  ;;  %v1019_v61 = vadd.f32 %v3325_v53, %v1018_v57 }
 0x2b5   : > { %v2218_v62 = vpack.c.bf16 %v995_v60, %v992_v58  ;;  %v2238_v63 = vpack.c.bf16 %v1019_v61, %v1016_v59 }
 0x2b7   : > { %2219 = vst [vmem:[#allocation3 + $0x30] sm:$0xff] %v2218_v62  }
 0x2b8   : > { %2298 = vst [vmem:[#allocation3 + $0x50] sm:$0xff] %v2238_v63  }
 0x2b9   : > { %v1042_v1 = vpop.f32.mrf.mxu2  ;;  %v1066_v2 = vpop.f32.mrf.mxu3 }
 0x2ba   : > { %v1043_v5 = vadd.f32 %v3325_v53, %v1042_v1  ;;  %v1067_v6 = vadd.f32 %v3325_v53, %v1066_v2  ;;  %v997_v7 = vpop.f32.mrf.mxu0  ;;  %v1021_v33 = vpop.f32.mrf.mxu1 }
 0x2bb   : > { %v998_v14 = vadd.f32 %v3325_v53, %v997_v7  ;;  %v1022_v15 = vadd.f32 %v3325_v53, %v1021_v33 }
 0x2bc   : > { %v2258_v8 = vpack.c.bf16 %v1043_v5, %v1040_v3  ;;  %v2278_v9 = vpack.c.bf16 %v1067_v6, %v1064_v4 }
 0x2be   : > { %2302 = vst [vmem:[#allocation3 + $0x40] sm:$0xff] %v2258_v8  }
 0x2bf   : > { %2306 = vst [vmem:[#allocation3 + $0x60] sm:$0xff] %v2278_v9  }
 0x2c1   : > { %v1045_v10 = vpop.f32.mrf.mxu2  ;;  %v1069_v11 = vpop.f32.mrf.mxu3 }
 0x2c2   : > { %v1000_v12 = vpop.f32.mrf.mxu0  ;;  %v1024_v13 = vpop.f32.mrf.mxu1  ;;  %v1046_v22 = vadd.f32 %v3325_v53, %v1045_v10  ;;  %v1070_v23 = vadd.f32 %v3325_v53, %v1069_v11 }
 0x2c3   : > { %v1001_v16 = vadd.f32 %v3325_v53, %v1000_v12  ;;  %v1025_v17 = vadd.f32 %v3325_v53, %v1024_v13 }
 0x2c5   : > { %v2223_v18 = vpack.c.bf16 %v1001_v16, %v998_v14  ;;  %v2243_v19 = vpack.c.bf16 %v1025_v17, %v1022_v15 }
 0x2c7   : > { %2295 = vst [vmem:[#allocation3] sm:$0xff] %v2223_v18  }
 0x2c8   : > { %2299 = vst [vmem:[#allocation3 + $0x68] sm:$0xff] %v2243_v19  }
 0x2c9   : > { %v1048_v20 = vpop.f32.mrf.mxu2  ;;  %v1072_v21 = vpop.f32.mrf.mxu3 }
 0x2ca   : > { %v1049_v24 = vadd.f32 %v3325_v53, %v1048_v20  ;;  %v1073_v25 = vadd.f32 %v3325_v53, %v1072_v21  ;;  %v1003_v26 = vpop.f32.mrf.mxu0  ;;  %v1027_v27 = vpop.f32.mrf.mxu1 }
 0x2cb   : > { %v1004_v35 = vadd.f32 %v3325_v53, %v1003_v26  ;;  %v1028_v36 = vadd.f32 %v3325_v53, %v1027_v27 }
 0x2cc   : > { %v2263_v28 = vpack.c.bf16 %v1049_v24, %v1046_v22  ;;  %v2283_v29 = vpack.c.bf16 %v1073_v25, %v1070_v23 }
 0x2ce   : > { %2303 = vst [vmem:[#allocation3 + $0x20] sm:$0xff] %v2263_v28  }
 0x2cf   : > { %2307 = vst [vmem:[#allocation3 + $0x70] sm:$0xff] %v2283_v29  }
 0x2d1   : > { %v1051_v30 = vpop.f32.mrf.mxu2  ;;  %v1075_v31 = vpop.f32.mrf.mxu3 }
 0x2d2   : > { %v1006_v32 = vpop.f32.mrf.mxu0  ;;  %v1030_v34 = vpop.f32.mrf.mxu1  ;;  %v1052_v0 = vadd.f32 %v3325_v53, %v1051_v30  ;;  %v1076_v43 = vadd.f32 %v3325_v53, %v1075_v31 }
 0x2d3   : > { %v1007_v37 = vadd.f32 %v3325_v53, %v1006_v32  ;;  %v1031_v38 = vadd.f32 %v3325_v53, %v1030_v34 }
 0x2d5   : > { %v2228_v39 = vpack.c.bf16 %v1007_v37, %v1004_v35  ;;  %v2248_v40 = vpack.c.bf16 %v1031_v38, %v1028_v36 }
 0x2d7   : > { %2296 = vst [vmem:[#allocation3 + $0x58] sm:$0xff] %v2228_v39  }
 0x2d8   : > { %2300 = vst [vmem:[#allocation3 + $0x8] sm:$0xff] %v2248_v40  }
 0x2d9   : > { %v1054_v41 = vpop.f32.mrf.mxu2  ;;  %v1078_v42 = vpop.f32.mrf.mxu3 }
 0x2da   : > { %v1055_v44 = vadd.f32 %v3325_v53, %v1054_v41  ;;  %v1079_v45 = vadd.f32 %v3325_v53, %v1078_v42  ;;  %v1009_v46 = vpop.f32.mrf.mxu0  ;;  %v1033_v47 = vpop.f32.mrf.mxu1 }
 0x2db   : > { %v1010_v55 = vadd.f32 %v3325_v53, %v1009_v46  ;;  %v1034_v56 = vadd.f32 %v3325_v53, %v1033_v47 }
 0x2dc   : > { %v2268_v48 = vpack.c.bf16 %v1055_v44, %v1052_v0  ;;  %v2288_v49 = vpack.c.bf16 %v1079_v45, %v1076_v43 }
 0x2de   : > { %2304 = vst [vmem:[#allocation3 + $0x10] sm:$0xff] %v2268_v48  }
 0x2df   : > { %2308 = vst [vmem:[#allocation3 + $0x78] sm:$0xff] %v2288_v49  }
 0x2e1   : > { %v1057_v50 = vpop.f32.mrf.mxu2  ;;  %v1081_v51 = vpop.f32.mrf.mxu3 }
 0x2e2   : > { %v1012_v52 = vpop.f32.mrf.mxu0  ;;  %v1036_v54 = vpop.f32.mrf.mxu1  ;;  %v1058_v63 = vadd.f32 %v3325_v53, %v1057_v50  ;;  %v1082_v1 = vadd.f32 %v3325_v53, %v1081_v51 }
 0x2e3   : > { %v1013_v57 = vadd.f32 %v3325_v53, %v1012_v52  ;;  %v1037_v58 = vadd.f32 %v3325_v53, %v1036_v54 }
 0x2e5   : > { %v2233_v59 = vpack.c.bf16 %v1013_v57, %v1010_v55  ;;  %v2253_v60 = vpack.c.bf16 %v1037_v58, %v1034_v56 }
 0x2e7   : > { %2297 = vst [vmem:[#allocation3 + $0x18] sm:$0xff] %v2233_v59  }
 0x2e8   : > { %2301 = vst [vmem:[#allocation3 + $0x48] sm:$0xff] %v2253_v60  }
 0x2e9   : > { %v1060_v61 = vpop.f32.mrf.mxu2  ;;  %v1084_v62 = vpop.f32.mrf.mxu3 }
 0x2ea   : > { %v1061_v2 = vadd.f32 %v3325_v53, %v1060_v61  ;;  %v1085_v3 = vadd.f32 %v3325_v53, %v1084_v62 }
 0x2ec   : > { %v2273_v4 = vpack.c.bf16 %v1061_v2, %v1058_v63  ;;  %v2293_v5 = vpack.c.bf16 %v1085_v3, %v1082_v1 }
 0x2ee   : > { %2305 = vst [vmem:[#allocation3 + $0x38] sm:$0xff] %v2273_v4  }
 0x2ef   : > { %2309 = vst [vmem:[#allocation3 + $0x28] sm:$0xff] %v2293_v5  }
 0x2f0 PF: > { %v2205_v6 = vld [vmem:[#allocation3 + $0x48] sm:$0xff]  ;;  %v2212_v8 = vld [vmem:[#allocation3 + $0x78] sm:$0xff]  ;;  %v2211_v10 = vld [vmem:[#allocation3 + $0x70] sm:$0xff]  ;;  %s1489_s15 = sld [smem:[#allocation4 + %s2966_s21]]  ;;  %s2173_s16 = sshll.u32 %s2962_s20, 7 }
 0x2f1   : > { %1375 = vmatpush.bf16.msra.mxu0 %v2205_v6  ;;  %2390 = vmatpush.bf16.msra.mxu2 %v2205_v6  ;;  %v2204_v33 = vld [vmem:[#allocation3 + $0x8] sm:$0xff]  ;;  %v2202_v53 = vld [vmem:[#allocation3 + $0x50] sm:$0xff]  ;;  %v2210_v11 = vld [vmem:[#allocation3 + $0x60] sm:$0xff]  ;;  %s3397_s26 = scalar_lea.vmem [#allocation2], %s2173_s16  ;;  %p2174_p10 = scmp.ne.s32.totalorder %s2966_s21, 2 }
 0x2f2   : > { %v2203_v9 = vld [vmem:[#allocation3 + $0x68] sm:$0xff]  ;;  %v2201_v12 = vld [vmem:[#allocation3 + $0x18] sm:$0xff]  ;;  %v2208_v15 = vld [vmem:[#allocation3 + $0x10] sm:$0xff]  ;;  %s3816_s3 = sld [smem:[#allocation34_spill]] (!%p2174_p10) }
 0x2f3   : > { %v2200_v14 = vld [vmem:[#allocation3 + $0x58] sm:$0xff]  ;;  %v2199_v16 = vld [vmem:[#allocation3] sm:$0xff]  ;;  %v2198_v18 = vld [vmem:[#allocation3 + $0x30] sm:$0xff] }
 0x2f4   : > { %v2207_v17 = vld [vmem:[#allocation3 + $0x20] sm:$0xff]  ;;  %v2183_v21 = vld [vmem:[%s3225_s9 + $0x4] sm:$0xf0]  ;;  %v2049_v25 = vld [vmem:[%s3225_s9 + $0x8] sm:$0xf0] }
 0x2f5   : > { %1376 = vmatpush.bf16.msra.mxu0 %v2204_v33  ;;  %2391 = vmatpush.bf16.msra.mxu2 %v2204_v33  ;;  %v2209_v13 = vld [vmem:[#allocation3 + $0x38] sm:$0xff]  ;;  %v2206_v19 = vld [vmem:[#allocation3 + $0x40] sm:$0xff]  ;;  %v2191_v23 = vld [vmem:[%s3225_s9 + $0x44] sm:$0xf0] }
 0x2f6   : > { %v2213_v7 = vld [vmem:[#allocation3 + $0x28] sm:$0xff]  ;;  %v2047_v20 = vld [vmem:[%s3225_s9] sm:$0xf]  ;;  %v2182_v24 = vld [vmem:[%s3225_s9 + $0x4] sm:$0xf] }
 0x2f7   : > { %1424 = vmatpush.bf16.msra.mxu1 %v2213_v7  ;;  %2398 = vmatpush.bf16.msra.mxu3 %v2213_v7  ;;  %v2079_v22 = vld [vmem:[%s3225_s9 + $0x40] sm:$0xf]  ;;  %v2190_v26 = vld [vmem:[%s3225_s9 + $0x44] sm:$0xf]  ;;  %v2081_v27 = vld [vmem:[%s3225_s9 + $0x48] sm:$0xf0]  ;;  %v2048_v28 = vor.u32 %v2183_v21, %v2047_v20  ;;  %v2052_v30 = vor.u32 %v2182_v24, %v2049_v25 }
 0x2f8   : > { %v2080_v29 = vor.u32 %v2191_v23, %v2079_v22  ;;  %v2084_v31 = vor.u32 %v2190_v26, %v2081_v27  ;;  %v2055_v32 = vld [vmem:[%s3225_s9 + $0x10] sm:$0xf]  ;;  %v2185_v34 = vld [vmem:[%s3225_s9 + $0x14] sm:$0xf0]  ;;  %v2184_v37 = vld [vmem:[%s3225_s9 + $0x14] sm:$0xf] }
 0x2f9   : > { %1377 = vmatpush.bf16.msra.mxu0 %v2203_v9  ;;  %2392 = vmatpush.bf16.msra.mxu2 %v2203_v9  ;;  %v2087_v35 = vld [vmem:[%s3225_s9 + $0x50] sm:$0xf]  ;;  %v2193_v36 = vld [vmem:[%s3225_s9 + $0x54] sm:$0xf0]  ;;  %v2057_v38 = vld [vmem:[%s3225_s9 + $0x18] sm:$0xf0]  ;;  %v2056_v41 = vor.u32 %v2185_v34, %v2055_v32 }
 0x2fa   : > { %v2192_v39 = vld [vmem:[%s3225_s9 + $0x54] sm:$0xf]  ;;  %v2089_v40 = vld [vmem:[%s3225_s9 + $0x58] sm:$0xf0]  ;;  %v2088_v42 = vor.u32 %v2193_v36, %v2087_v35  ;;  %v2060_v0 = vor.u32 %v2184_v37, %v2057_v38  ;;  %v2063_v44 = vld [vmem:[%s3225_s9 + $0x20] sm:$0xf] }
 0x2fb   : > { %1425 = vmatpush.bf16.msra.mxu1 %v2212_v8  ;;  %2399 = vmatpush.bf16.msra.mxu3 %v2212_v8  ;;  %v2092_v43 = vor.u32 %v2192_v39, %v2089_v40  ;;  %v2187_v45 = vld [vmem:[%s3225_s9 + $0x24] sm:$0xf0]  ;;  %v2095_v46 = vld [vmem:[%s3225_s9 + $0x60] sm:$0xf]  ;;  %v2186_v48 = vld [vmem:[%s3225_s9 + $0x24] sm:$0xf]  ;;  %v3393_v8 = vstv %s1489_s15 }
 0x2fc   : > { %v2195_v47 = vld [vmem:[%s3225_s9 + $0x64] sm:$0xf0]  ;;  %v2065_v49 = vld [vmem:[%s3225_s9 + $0x28] sm:$0xf0]  ;;  %v2194_v50 = vld [vmem:[%s3225_s9 + $0x64] sm:$0xf]  ;;  %v2064_v52 = vor.u32 %v2187_v45, %v2063_v44 }
 0x2fd   : > { %1378 = vmatpush.bf16.msra.mxu0 %v2202_v53  ;;  %2393 = vmatpush.bf16.msra.mxu2 %v2202_v53  ;;  %v2097_v51 = vld [vmem:[%s3225_s9 + $0x68] sm:$0xf0]  ;;  %v2096_v54 = vor.u32 %v2195_v47, %v2095_v46  ;;  %v2068_v55 = vor.u32 %v2186_v48, %v2065_v49  ;;  %v2071_v57 = vld [vmem:[%s3225_s9 + $0x30] sm:$0xf]  ;;  %v2189_v58 = vld [vmem:[%s3225_s9 + $0x34] sm:$0xf0] }
 0x2fe   : > { %v2100_v56 = vor.u32 %v2194_v50, %v2097_v51  ;;  %v2103_v59 = vld [vmem:[%s3225_s9 + $0x70] sm:$0xf]  ;;  %v2197_v60 = vld [vmem:[%s3225_s9 + $0x74] sm:$0xf0]  ;;  %v2188_v61 = vld [vmem:[%s3225_s9 + $0x34] sm:$0xf]  ;;  %v2072_v2 = vor.u32 %v2189_v58, %v2071_v57 }
 0x2ff   : > { %1426 = vmatpush.bf16.msra.mxu1 %v2211_v10  ;;  %2400 = vmatpush.bf16.msra.mxu3 %v2211_v10  ;;  %v2073_v62 = vld [vmem:[%s3225_s9 + $0x38] sm:$0xf0]  ;;  %v2196_v63 = vld [vmem:[%s3225_s9 + $0x74] sm:$0xf]  ;;  %v2104_v3 = vor.u32 %v2197_v60, %v2103_v59  ;;  %v1492_v10 = vld [vmem:[%s3397_s26] sm:$0xff] }
 0x300   : > { %v2105_v1 = vld [vmem:[%s3225_s9 + $0x78] sm:$0xf0]  ;;  %v2076_v4 = vor.u32 %v2188_v61, %v2073_v62  ;;  %v1493_v22 = vld [vmem:[%s3397_s26 + $0x8] sm:$0xff]  ;;  %v1494_v37 = vld [vmem:[%s3397_s26 + $0x10] sm:$0xff] }
 0x301   : > { %1379 = vmatpush.bf16.msra.mxu0 %v2201_v12  ;;  %2394 = vmatpush.bf16.msra.mxu2 %v2201_v12  ;;  %v2108_v5 = vor.u32 %v2196_v63, %v2105_v1  ;;  %v1501_v34 = vld [vmem:[%s3397_s26 + $0x48] sm:$0xff]  ;;  %v1502_v47 = vld [vmem:[%s3397_s26 + $0x50] sm:$0xff]  ;;  %v1495_v50 = vld [vmem:[%s3397_s26 + $0x18] sm:$0xff] }
 0x302   : > { %v1503_v62 = vld [vmem:[%s3397_s26 + $0x58] sm:$0xff] }
 0x303   : > { %1427 = vmatpush.bf16.msra.mxu1 %v2210_v11  ;;  %2401 = vmatpush.bf16.msra.mxu3 %v2210_v11 }
 0x305   : > { %1380 = vmatpush.bf16.msra.mxu0 %v2200_v14  ;;  %2395 = vmatpush.bf16.msra.mxu2 %v2200_v14 }
 0x307   : > { %1428 = vmatpush.bf16.msra.mxu1 %v2209_v13  ;;  %2402 = vmatpush.bf16.msra.mxu3 %v2209_v13 }
 0x309   : > { %1381 = vmatpush.bf16.msra.mxu0 %v2199_v16  ;;  %2396 = vmatpush.bf16.msra.mxu2 %v2199_v16 }
 0x30b   : > { %1429 = vmatpush.bf16.msra.mxu1 %v2208_v15  ;;  %2403 = vmatpush.bf16.msra.mxu3 %v2208_v15 }
 0x30d   : > { %1382 = vmatpush.bf16.msra.mxu0 %v2198_v18  ;;  %2397 = vmatpush.bf16.msra.mxu2 %v2198_v18 }
 0x30f   : > { %1430 = vmatpush.bf16.msra.mxu1 %v2207_v17  ;;  %2404 = vmatpush.bf16.msra.mxu3 %v2207_v17 }
 0x310   : > { %1383 = vmatmul.bf16.vlgmr.msra.gmra.mxu0 %v2048_v28  ;;  %1403 = vmatmul.bf16.vlgmr.msra.gmra.mxu2 %v2080_v29 }
 0x313   : > { %1431 = vmatpush.bf16.msra.mxu1 %v2206_v19  ;;  %2405 = vmatpush.bf16.msra.mxu3 %v2206_v19  ;;  %v1500_v19 = vld [vmem:[%s3397_s26 + $0x40] sm:$0xff] }
 0x316   : > { %1432 = vmatmul.bf16.vlgmr.msra.gmra.mxu1 %v2052_v30  ;;  %1452 = vmatmul.bf16.vlgmr.msra.gmra.mxu3 %v2084_v31 }
 0x320   : > { %1388 = vmatmul.bf16.gmra.mxu0 %v2056_v41  ;;  %1408 = vmatmul.bf16.gmra.mxu2 %v2088_v42 }
 0x326   : > { %1437 = vmatmul.bf16.gmra.mxu1 %v2060_v0  ;;  %1457 = vmatmul.bf16.gmra.mxu3 %v2092_v43 }
 0x330   : > { %1393 = vmatmul.bf16.gmra.mxu0 %v2064_v52  ;;  %1413 = vmatmul.bf16.gmra.mxu2 %v2096_v54 }
 0x336   : > { %1442 = vmatmul.bf16.gmra.mxu1 %v2068_v55  ;;  %1462 = vmatmul.bf16.gmra.mxu3 %v2100_v56 }
 0x340   : > { %1398 = vmatmul.bf16.gmra.mxu0 %v2072_v2  ;;  %1418 = vmatmul.bf16.gmra.mxu2 %v2104_v3  ;;  %v1496_v2 = vld [vmem:[%s3397_s26 + $0x20] sm:$0xff] }
 0x346   : > { %1447 = vmatmul.bf16.gmra.mxu1 %v2076_v4  ;;  %1467 = vmatmul.bf16.gmra.mxu3 %v2108_v5 }
 0x38d   : > { %v1384_v6 = vpop.f32.mrf.mxu0 }
 0x393   : > { %v1433_v7 = vpop.f32.mrf.mxu1  ;;  %v1404_v11 = vpop.f32.mrf.mxu2 }
 0x394   : > { %v1434_v33 = vadd.f32 %v1433_v7, %v1384_v6 }
 0x395   : > { %v1386_v15 = vpop.f32.mrf.mxu0 }
 0x396   : > { %v1473_v9 = vmax.f32 %v1434_v33, 0.0 }
 0x398   : > { %v1509_v53 = vmul.f32 %v3393_v8, %v1473_v9 }
 0x399   : > { %v1453_v12 = vpop.f32.mrf.mxu3 }
 0x39a   : > { %v3401_v13 = vadd.f32 %v1509_v53, %v1492_v10  ;;  %v1454_v14 = vadd.f32 %v1453_v12, %v1404_v11  ;;  %v1504_v12 = vld [vmem:[%s3397_s26 + $0x60] sm:$0xff] }
 0x39b   : > { %v1435_v16 = vpop.f32.mrf.mxu1  ;;  %v1406_v25 = vpop.f32.mrf.mxu2 }
 0x39c   : > { %1541 = vst [vmem:[%s3397_s26] sm:$0xff] %v3401_v13  ;;  %v1481_v17 = vmax.f32 %v1454_v14, 0.0  ;;  %v1436_v18 = vadd.f32 %v1435_v16, %v1386_v15  ;;  %v1497_v16 = vld [vmem:[%s3397_s26 + $0x28] sm:$0xff] }
 0x39d   : > { %v1389_v29 = vpop.f32.mrf.mxu0 }
 0x39e   : > { %v1517_v20 = vmul.f32 %v3393_v8, %v1481_v17  ;;  %v1474_v21 = vmax.f32 %v1436_v18, 0.0 }
 0x3a0   : > { %v3408_v23 = vadd.f32 %v1517_v20, %v1500_v19  ;;  %v1510_v24 = vmul.f32 %v3393_v8, %v1474_v21 }
 0x3a1   : > { %v1455_v26 = vpop.f32.mrf.mxu3 }
 0x3a2   : > { %1549 = vst [vmem:[%s3397_s26 + $0x40] sm:$0xff] %v3408_v23  ;;  %v3413_v27 = vadd.f32 %v1510_v24, %v1493_v22  ;;  %v1456_v28 = vadd.f32 %v1455_v26, %v1406_v25 }
 0x3a3   : > { %v1438_v30 = vpop.f32.mrf.mxu1  ;;  %v1409_v40 = vpop.f32.mrf.mxu2 }
 0x3a4   : > { %1542 = vst [vmem:[%s3397_s26 + $0x8] sm:$0xff] %v3413_v27  ;;  %v1482_v31 = vmax.f32 %v1456_v28, 0.0  ;;  %v1439_v32 = vadd.f32 %v1438_v30, %v1389_v29  ;;  %v1505_v29 = vld [vmem:[%s3397_s26 + $0x68] sm:$0xff] }
 0x3a5   : > { %v1391_v43 = vpop.f32.mrf.mxu0 }
 0x3a6   : > { %v1518_v35 = vmul.f32 %v3393_v8, %v1482_v31  ;;  %v1475_v36 = vmax.f32 %v1439_v32, 0.0  ;;  %v1498_v32 = vld [vmem:[%s3397_s26 + $0x30] sm:$0xff] }
 0x3a8   : > { %v3420_v38 = vadd.f32 %v1518_v35, %v1501_v34  ;;  %v1511_v39 = vmul.f32 %v3393_v8, %v1475_v36 }
 0x3a9   : > { %v1458_v41 = vpop.f32.mrf.mxu3 }
 0x3aa   : > { %1550 = vst [vmem:[%s3397_s26 + $0x48] sm:$0xff] %v3420_v38  ;;  %v3425_v42 = vadd.f32 %v1511_v39, %v1494_v37  ;;  %v1459_v0 = vadd.f32 %v1458_v41, %v1409_v40 }
 0x3ab   : > { %v1440_v44 = vpop.f32.mrf.mxu1  ;;  %v1411_v54 = vpop.f32.mrf.mxu2 }
 0x3ac   : > { %1543 = vst [vmem:[%s3397_s26 + $0x10] sm:$0xff] %v3425_v42  ;;  %v1483_v45 = vmax.f32 %v1459_v0, 0.0  ;;  %v1441_v46 = vadd.f32 %v1440_v44, %v1391_v43 }
 0x3ad   : > { %v1394_v58 = vpop.f32.mrf.mxu0 }
 0x3ae   : > { %v1519_v48 = vmul.f32 %v3393_v8, %v1483_v45  ;;  %v1476_v49 = vmax.f32 %v1441_v46, 0.0  ;;  %v1506_v45 = vld [vmem:[%s3397_s26 + $0x70] sm:$0xff] }
 0x3b0   : > { %v3432_v51 = vadd.f32 %v1519_v48, %v1502_v47  ;;  %v1512_v52 = vmul.f32 %v3393_v8, %v1476_v49  ;;  %v1499_v48 = vld [vmem:[%s3397_s26 + $0x38] sm:$0xff] }
 0x3b1   : > { %v1460_v55 = vpop.f32.mrf.mxu3 }
 0x3b2   : > { %1551 = vst [vmem:[%s3397_s26 + $0x50] sm:$0xff] %v3432_v51  ;;  %v3437_v56 = vadd.f32 %v1512_v52, %v1495_v50  ;;  %v1461_v57 = vadd.f32 %v1460_v55, %v1411_v54 }
 0x3b3   : > { %v1443_v59 = vpop.f32.mrf.mxu1  ;;  %v1414_v5 = vpop.f32.mrf.mxu2 }
 0x3b4   : > { %1544 = vst [vmem:[%s3397_s26 + $0x18] sm:$0xff] %v3437_v56  ;;  %v1484_v60 = vmax.f32 %v1461_v57, 0.0  ;;  %v1444_v61 = vadd.f32 %v1443_v59, %v1394_v58  ;;  %v1507_v59 = vld [vmem:[%s3397_s26 + $0x78] sm:$0xff] }
 0x3b5   : > { %v1396_v9 = vpop.f32.mrf.mxu0 }
 0x3b6   : > { %v1520_v63 = vmul.f32 %v3393_v8, %v1484_v60  ;;  %v1477_v1 = vmax.f32 %v1444_v61, 0.0 }
 0x3b8   : > { %v3444_v3 = vadd.f32 %v1520_v63, %v1503_v62  ;;  %v1513_v4 = vmul.f32 %v3393_v8, %v1477_v1 }
 0x3b9   : > { %v1463_v6 = vpop.f32.mrf.mxu3 }
 0x3ba   : > { %1552 = vst [vmem:[%s3397_s26 + $0x58] sm:$0xff] %v3444_v3  ;;  %v3449_v7 = vadd.f32 %v1513_v4, %v1496_v2  ;;  %v1464_v33 = vadd.f32 %v1463_v6, %v1414_v5 }
 0x3bb   : > { %v1445_v10 = vpop.f32.mrf.mxu1  ;;  %v1416_v19 = vpop.f32.mrf.mxu2 }
 0x3bc   : > { %1545 = vst [vmem:[%s3397_s26 + $0x20] sm:$0xff] %v3449_v7  ;;  %v1485_v53 = vmax.f32 %v1464_v33, 0.0  ;;  %v1446_v11 = vadd.f32 %v1445_v10, %v1396_v9 }
 0x3bd   : > { %v1399_v24 = vpop.f32.mrf.mxu0 }
 0x3be   : > { %v1521_v14 = vmul.f32 %v3393_v8, %v1485_v53  ;;  %v1478_v15 = vmax.f32 %v1446_v11, 0.0 }
 0x3c0   : > { %v3456_v17 = vadd.f32 %v1521_v14, %v1504_v12  ;;  %v1514_v18 = vmul.f32 %v3393_v8, %v1478_v15 }
 0x3c1   : > { %v1465_v20 = vpop.f32.mrf.mxu3 }
 0x3c2   : > { %1553 = vst [vmem:[%s3397_s26 + $0x60] sm:$0xff] %v3456_v17  ;;  %v3461_v21 = vadd.f32 %v1514_v18, %v1497_v16  ;;  %v1466_v22 = vadd.f32 %v1465_v20, %v1416_v19 }
 0x3c3   : > { %v1448_v25 = vpop.f32.mrf.mxu1  ;;  %v1419_v36 = vpop.f32.mrf.mxu2 }
 0x3c4   : > { %1546 = vst [vmem:[%s3397_s26 + $0x28] sm:$0xff] %v3461_v21  ;;  %v1486_v26 = vmax.f32 %v1466_v22, 0.0  ;;  %v1449_v28 = vadd.f32 %v1448_v25, %v1399_v24 }
 0x3c5   : > { %v1401_v41 = vpop.f32.mrf.mxu0 }
 0x3c6   : > { %v1522_v30 = vmul.f32 %v3393_v8, %v1486_v26  ;;  %v1479_v31 = vmax.f32 %v1449_v28, 0.0 }
 0x3c8   : > { %v3468_v34 = vadd.f32 %v1522_v30, %v1505_v29  ;;  %v1515_v35 = vmul.f32 %v3393_v8, %v1479_v31 }
 0x3c9   : > { %v1468_v37 = vpop.f32.mrf.mxu3 }
 0x3ca   : > { %1554 = vst [vmem:[%s3397_s26 + $0x68] sm:$0xff] %v3468_v34  ;;  %v3473_v39 = vadd.f32 %v1515_v35, %v1498_v32  ;;  %v1469_v40 = vadd.f32 %v1468_v37, %v1419_v36 }
 0x3cb   : > { %v1450_v0 = vpop.f32.mrf.mxu1  ;;  %v1421_v52 = vpop.f32.mrf.mxu2 }
 0x3cc   : > { %1547 = vst [vmem:[%s3397_s26 + $0x30] sm:$0xff] %v3473_v39  ;;  %v1487_v43 = vmax.f32 %v1469_v40, 0.0  ;;  %v1451_v44 = vadd.f32 %v1450_v0, %v1401_v41 }
 0x3ce   : > { %v1523_v46 = vmul.f32 %v3393_v8, %v1487_v43  ;;  %v1480_v47 = vmax.f32 %v1451_v44, 0.0 }
 0x3d0   : > { %v3480_v49 = vadd.f32 %v1523_v46, %v1506_v45  ;;  %v1516_v50 = vmul.f32 %v3393_v8, %v1480_v47 }
 0x3d1   : > { %v1470_v54 = vpop.f32.mrf.mxu3 }
 0x3d2   : > { %1555 = vst [vmem:[%s3397_s26 + $0x70] sm:$0xff] %v3480_v49  ;;  %v3485_v55 = vadd.f32 %v1516_v50, %v1499_v48  ;;  %v1471_v57 = vadd.f32 %v1470_v54, %v1421_v52 }
 0x3d4   : > { %1548 = vst [vmem:[%s3397_s26 + $0x38] sm:$0xff] %v3485_v55  ;;  %v1488_v58 = vmax.f32 %v1471_v57, 0.0 }
 0x3d6   : > { %v1524_v60 = vmul.f32 %v3393_v8, %v1488_v58  ;;  %1560 = sbr.rel (%p2174_p10) target bundleno = 1453 (0x5ad), region = 104 }
 0x3d8   : > { %v3491_v61 = vadd.f32 %v1524_v60, %v1507_v59 }
 0x3da   : > { %1556 = vst [vmem:[%s3397_s26 + $0x78] sm:$0xff] %v3491_v61 }
 0x3db   : > { %v1576_v62 = vld [vmem:[#allocation15 + $0x78] sm:$0xff]  ;;  %v1575_v63 = vld [vmem:[#allocation15 + $0x70] sm:$0xff]  ;;  %v1574_v1 = vld [vmem:[#allocation15 + $0x68] sm:$0xff] }
 0x3dc   : > { %1581 = vmatpush.msra.mxu0 %v1576_v62  ;;  %2406 = vmatpush.msra.mxu1 %v1576_v62  ;;  %v1573_v2 = vld [vmem:[#allocation15 + $0x60] sm:$0xff]  ;;  %v1572_v8 = vld [vmem:[#allocation15 + $0x58] sm:$0xff]  ;;  %v1571_v4 = vld [vmem:[#allocation15 + $0x50] sm:$0xff] }
 0x3dd   : > { %2407 = vmatpush.msra.mxu2 %v1576_v62  ;;  %2408 = vmatpush.msra.mxu3 %v1576_v62  ;;  %v1570_v5 = vld [vmem:[#allocation15 + $0x48] sm:$0xff]  ;;  %v1569_v6 = vld [vmem:[#allocation15 + $0x40] sm:$0xff]  ;;  %v1568_v33 = vld [vmem:[#allocation15 + $0x38] sm:$0xff] }
 0x3de   : > { %1582 = vmatpush.msra.mxu0 %v1575_v63  ;;  %2409 = vmatpush.msra.mxu1 %v1575_v63  ;;  %v1567_v9 = vld [vmem:[#allocation15 + $0x30] sm:$0xff]  ;;  %v1566_v10 = vld [vmem:[#allocation15 + $0x28] sm:$0xff]  ;;  %v1565_v53 = vld [vmem:[#allocation15 + $0x20] sm:$0xff] }
 0x3df   : > { %2410 = vmatpush.msra.mxu2 %v1575_v63  ;;  %2411 = vmatpush.msra.mxu3 %v1575_v63  ;;  %v1564_v11 = vld [vmem:[#allocation15 + $0x18] sm:$0xff]  ;;  %v1563_v12 = vld [vmem:[#allocation15 + $0x10] sm:$0xff]  ;;  %v1562_v14 = vld [vmem:[#allocation15 + $0x8] sm:$0xff] }
 0x3e0   : > { %1583 = vmatpush.msra.mxu0 %v1574_v1  ;;  %2412 = vmatpush.msra.mxu1 %v1574_v1  ;;  %v1561_v15 = vld [vmem:[#allocation15] sm:$0xff] }
 0x3e1   : > { %2413 = vmatpush.msra.mxu2 %v1574_v1  ;;  %2414 = vmatpush.msra.mxu3 %v1574_v1 }
 0x3e2   : > { %1584 = vmatpush.msra.mxu0 %v1573_v2  ;;  %2415 = vmatpush.msra.mxu1 %v1573_v2 }
 0x3e3   : > { %2416 = vmatpush.msra.mxu2 %v1573_v2  ;;  %2417 = vmatpush.msra.mxu3 %v1573_v2 }
 0x3e4   : > { %1585 = vmatpush.msra.mxu0 %v1572_v8  ;;  %2418 = vmatpush.msra.mxu1 %v1572_v8 }
 0x3e5   : > { %2419 = vmatpush.msra.mxu2 %v1572_v8  ;;  %2420 = vmatpush.msra.mxu3 %v1572_v8 }
 0x3e6   : > { %1586 = vmatpush.msra.mxu0 %v1571_v4  ;;  %2421 = vmatpush.msra.mxu1 %v1571_v4 }
 0x3e7   : > { %2422 = vmatpush.msra.mxu2 %v1571_v4  ;;  %2423 = vmatpush.msra.mxu3 %v1571_v4 }
 0x3e8   : > { %1587 = vmatpush.msra.mxu0 %v1570_v5  ;;  %2424 = vmatpush.msra.mxu1 %v1570_v5 }
 0x3e9   : > { %2425 = vmatpush.msra.mxu2 %v1570_v5  ;;  %2426 = vmatpush.msra.mxu3 %v1570_v5 }
 0x3ea   : > { %1588 = vmatpush.msra.mxu0 %v1569_v6  ;;  %2427 = vmatpush.msra.mxu1 %v1569_v6 }
 0x3eb   : > { %2428 = vmatpush.msra.mxu2 %v1569_v6  ;;  %2429 = vmatpush.msra.mxu3 %v1569_v6 }
 0x3ec   : > { %1589 = vmatpush.msra.mxu0 %v1568_v33  ;;  %2430 = vmatpush.msra.mxu1 %v1568_v33 }
 0x3ed   : > { %2431 = vmatpush.msra.mxu2 %v1568_v33  ;;  %2432 = vmatpush.msra.mxu3 %v1568_v33 }
 0x3ee   : > { %1590 = vmatpush.msra.mxu0 %v1567_v9  ;;  %2433 = vmatpush.msra.mxu1 %v1567_v9 }
 0x3ef   : > { %2434 = vmatpush.msra.mxu2 %v1567_v9  ;;  %2435 = vmatpush.msra.mxu3 %v1567_v9 }
 0x3f0   : > { %1591 = vmatpush.msra.mxu0 %v1566_v10  ;;  %2436 = vmatpush.msra.mxu1 %v1566_v10 }
 0x3f1   : > { %2437 = vmatpush.msra.mxu2 %v1566_v10  ;;  %2438 = vmatpush.msra.mxu3 %v1566_v10 }
 0x3f2   : > { %1592 = vmatpush.msra.mxu0 %v1565_v53  ;;  %2439 = vmatpush.msra.mxu1 %v1565_v53 }
 0x3f3   : > { %2440 = vmatpush.msra.mxu2 %v1565_v53  ;;  %2441 = vmatpush.msra.mxu3 %v1565_v53 }
 0x3f4   : > { %1593 = vmatpush.msra.mxu0 %v1564_v11  ;;  %2442 = vmatpush.msra.mxu1 %v1564_v11 }
 0x3f5   : > { %2443 = vmatpush.msra.mxu2 %v1564_v11  ;;  %2444 = vmatpush.msra.mxu3 %v1564_v11 }
 0x3f6   : > { %1594 = vmatpush.msra.mxu0 %v1563_v12  ;;  %2445 = vmatpush.msra.mxu1 %v1563_v12 }
 0x3f7   : > { %2446 = vmatpush.msra.mxu2 %v1563_v12  ;;  %2447 = vmatpush.msra.mxu3 %v1563_v12 }
 0x3f8   : > { %1595 = vmatpush.msra.mxu0 %v1562_v14  ;;  %2448 = vmatpush.msra.mxu1 %v1562_v14 }
 0x3f9   : > { %2449 = vmatpush.msra.mxu2 %v1562_v14  ;;  %2450 = vmatpush.msra.mxu3 %v1562_v14 }
 0x3fa   : > { %1596 = vmatpush.msra.mxu0 %v1561_v15  ;;  %2451 = vmatpush.msra.mxu1 %v1561_v15 }
 0x3fb   : > { %2452 = vmatpush.msra.mxu2 %v1561_v15  ;;  %1597 = vmatmul.f32.vlgmr.msra.gmra.mxu0 %v3401_v13  ;;  %v1646_v13 = vlaneseq }
 0x3fc   : > { %1609 = vmatmul.f32.vlgmr.msra.gmra.mxu1 %v3449_v7  ;;  %1621 = vmatmul.f32.vlgmr.msra.gmra.mxu2 %v3408_v23 }
 0x3fd   : > { %2453 = vmatpush.msra.mxu3 %v1561_v15  ;;  %v3512_v23 = vand.u32 127, %v1646_v13 }
 0x3fe   : > { %1633 = vmatmul.f32.vlgmr.msra.gmra.mxu3 %v3456_v17 }
 0x3ff   : > { %vm1648_vm0 = vcmp.lt.s32.totalorder %v3512_v23, 7 }
 0x403   : > { %1600 = vmatmul.f32.gmra.mxu0 %v3413_v27  ;;  %v3517_v27 = vld [vmem:[%s3816_s3] ss:$0 sm:$0xff] }
 0x404   : > { %1624 = vmatmul.f32.gmra.mxu2 %v3420_v38  ;;  %1612 = vmatmul.f32.gmra.mxu1 %v3461_v21 }
 0x406   : > { %1636 = vmatmul.f32.gmra.mxu3 %v3468_v34 }
 0x40b   : > { %1603 = vmatmul.f32.gmra.mxu0 %v3425_v42 }
 0x40c   : > { %1627 = vmatmul.f32.gmra.mxu2 %v3432_v51  ;;  %1615 = vmatmul.f32.gmra.mxu1 %v3473_v39 }
 0x40e   : > { %1639 = vmatmul.f32.gmra.mxu3 %v3480_v49 }
 0x413   : > { %1606 = vmatmul.f32.gmra.mxu0 %v3437_v56 }
 0x414   : > { %1630 = vmatmul.f32.gmra.mxu2 %v3444_v3  ;;  %1618 = vmatmul.f32.gmra.mxu1 %v3485_v55 }
 0x416   : > { %1642 = vmatmul.f32.gmra.mxu3 %v3491_v61 }
 0x478   : > { %v1598_v38 = vpop.f32.mrf.mxu0 }
 0x479   : > { %v1599_v42 = vadd.f32 %v3517_v27, %v1598_v38  ;;  %v1610_v51 = vpop.f32.mrf.mxu1 }
 0x47a   : > { %v1611_v56 = vadd.f32 %v3517_v27, %v1610_v51 }
 0x47b   : > { %v1649_v3 = vsel %vm1648_vm0, %v1599_v42, -1e+30 }
 0x47c   : > { %v1653_v7 = vsel %vm1648_vm0, %v1611_v56, -1e+30  ;;  %1665 = vmax.xlane.f32.xlu0 %v1649_v3 }
 0x47d   : > { %1673 = vmax.xlane.f32.xlu2 %v1653_v7 }
 0x47f   : > { %v1622_v16 = vpop.f32.mrf.mxu2 }
 0x480   : > { %v1623_v17 = vadd.f32 %v3517_v27, %v1622_v16  ;;  %v1601_v18 = vpop.f32.mrf.mxu0 }
 0x481   : > { %v1634_v19 = vpop.f32.mrf.mxu3  ;;  %v1613_v22 = vpop.f32.mrf.mxu1  ;;  %v1602_v28 = vadd.f32 %v3517_v27, %v1601_v18 }
 0x482   : > { %v1635_v20 = vadd.f32 %v3517_v27, %v1634_v19  ;;  %v1657_v21 = vsel %vm1648_vm0, %v1623_v17, -1e+30  ;;  %v1614_v25 = vadd.f32 %v3517_v27, %v1613_v22 }
 0x483   : > { %v3546_v35 = vsel %vm1648_vm0, %v1602_v28, -1e+30 }
 0x484   : > { %v1661_v24 = vsel %vm1648_vm0, %v1635_v20, -1e+30  ;;  %v3537_v32 = vsel %vm1648_vm0, %v1614_v25, -1e+30 }
 0x485   : > { %1681 = vmax.xlane.f32.xlu2 %v1657_v21  ;;  %1689 = vmax.xlane.f32.xlu0 %v1661_v24 }
 0x487   : > { %v1625_v26 = vpop.f32.mrf.mxu2 }
 0x488   : > { %v1604_v29 = vpop.f32.mrf.mxu0  ;;  %v1626_v37 = vadd.f32 %v3517_v27, %v1625_v26 }
 0x489   : > { %v1605_v30 = vadd.f32 %v3517_v27, %v1604_v29  ;;  %v1637_v31 = vpop.f32.mrf.mxu3  ;;  %v1616_v40 = vpop.f32.mrf.mxu1 }
 0x48a   : > { %v3559_v44 = vsel %vm1648_vm0, %v1626_v37, -1e+30  ;;  %v1617_v46 = vadd.f32 %v3517_v27, %v1616_v40  ;;  %v1638_v63 = vadd.f32 %v3517_v27, %v1637_v31 }
 0x48b   : > { %v3541_v34 = vsel %vm1648_vm0, %v1605_v30, -1e+30 }
 0x48c   : > { %1669 = vmax.xlane.f32.xlu1 %v3541_v34  ;;  %v3575_v52 = vsel %vm1648_vm0, %v1617_v46, -1e+30  ;;  %v3601_v1 = vsel %vm1648_vm0, %v1638_v63, -1e+30 }
 0x48d   : > { %1675 = vmax.xlane.f32.xlu2 %v3537_v32  ;;  %1667 = vmax.xlane.f32.xlu0 %v3546_v35 }
 0x48f   : > { %v1628_v36 = vpop.f32.mrf.mxu2 }
 0x490   : > { %v1629_v39 = vadd.f32 %v3517_v27, %v1628_v36  ;;  %v1607_v43 = vpop.f32.mrf.mxu0 }
 0x491   : > { %v1640_v41 = vpop.f32.mrf.mxu3  ;;  %v1608_v45 = vadd.f32 %v3517_v27, %v1607_v43  ;;  %v1619_v54 = vpop.f32.mrf.mxu1 }
 0x492   : > { %v3554_v0 = vsel %vm1648_vm0, %v1629_v39, -1e+30  ;;  %v1641_v57 = vadd.f32 %v3517_v27, %v1640_v41  ;;  %v1620_v58 = vadd.f32 %v3517_v27, %v1619_v54 }
 0x493   : > { %v3567_v49 = vsel %vm1648_vm0, %v1608_v45, -1e+30 }
 0x494   : > { %1685 = vmax.xlane.f32.xlu1 %v3554_v0  ;;  %v3585_v60 = vsel %vm1648_vm0, %v1641_v57, -1e+30  ;;  %v3589_v61 = vsel %vm1648_vm0, %v1620_v58, -1e+30 }
 0x495   : > { %1683 = vmax.xlane.f32.xlu0 %v3559_v44 }
 0x497   : > { %v1631_v47 = vpop.f32.mrf.mxu2 }
 0x498   : > { %v1632_v48 = vadd.f32 %v3517_v27, %v1631_v47 }
 0x499   : > { %v1643_v55 = vpop.f32.mrf.mxu3 }
 0x49a   : > { %v3571_v50 = vsel %vm1648_vm0, %v1632_v48, -1e+30  ;;  %v1644_v59 = vadd.f32 %v3517_v27, %v1643_v55 }
 0x49b   : > { %1687 = vmax.xlane.f32.xlu2 %v3571_v50 }
 0x49c   : > { %1671 = vmax.xlane.f32.xlu1 %v3567_v49  ;;  %v3593_v62 = vsel %vm1648_vm0, %v1644_v59, -1e+30 }
 0x49d   : > { %1677 = vmax.xlane.f32.xlu0 %v3575_v52 }
 0x4a3   : > { %1693 = vmax.xlane.f32.xlu2 %v3585_v60 }
 0x4a4   : > { %1679 = vmax.xlane.f32.xlu1 %v3589_v61 }
 0x4a5   : > { %1695 = vmax.xlane.f32.xlu0 %v3593_v62 }
 0x4ac   : > { %1691 = vmax.xlane.f32.xlu1 %v3601_v1 }
 0x4ef   : > { %v1666_v2 = vpop.xlane.xlu0 %1665 }
 0x4f0   : > { %v1674_v8 = vpop.xlane.xlu2 %1673  ;;  %v3604_v4 = vsub.f32 %v1649_v3, %v1666_v2 }
 0x4f1   : > { %v3606_v5 = vsub.f32 %v1653_v7, %v1674_v8 }
 0x4f2   : > { %v1713_v6 = vmul.f32 1.442695, %v3604_v4 }
 0x4f3   : > { %v1721_v33 = vmul.f32 1.442695, %v3606_v5 }
 0x4f4   : > { %2601 = vpow2.f32 %v1713_v6 }
 0x4f5   : > { %2603 = vpow2.f32 %v1721_v33 }
 0x4f8   : > { %v1682_v9 = vpop.xlane.xlu2 %1681  ;;  %v1690_v10 = vpop.xlane.xlu0 %1689 }
 0x4f9   : > { %v3610_v53 = vsub.f32 %v1657_v21, %v1682_v9  ;;  %v3612_v11 = vsub.f32 %v1661_v24, %v1690_v10 }
 0x4fa   : > { %v2602_v12 = vpop.eup %2601 }
 0x4fb   : > { %v2604_v14 = vpop.eup %2603  ;;  %v1729_v15 = vmul.f32 1.442695, %v3610_v53  ;;  %v1737_v13 = vmul.f32 1.442695, %v3612_v11  ;;  %v1745_v27 = vsel %vm1648_vm0, %v2602_v12, 0.0 }
 0x4fc   : > { %v1749_v38 = vsel %vm1648_vm0, %v2604_v14, 0.0  ;;  %1761 = vadd.xlane.f32.xlu1 %v1745_v27 }
 0x4fd   : > { %2605 = vpow2.f32 %v1729_v15  ;;  %1769 = vadd.xlane.f32.xlu2 %v1749_v38 }
 0x4fe   : > { %2607 = vpow2.f32 %v1737_v13 }
 0x4ff   : > { %v1670_v42 = vpop.xlane.xlu1 %1669 }
 0x500   : > { %v1676_v51 = vpop.xlane.xlu2 %1675  ;;  %v1668_v56 = vpop.xlane.xlu0 %1667  ;;  %v3628_v18 = vsub.f32 %v3541_v34, %v1670_v42 }
 0x501   : > { %v3621_v3 = vsub.f32 %v3537_v32, %v1676_v51  ;;  %v3624_v7 = vsub.f32 %v3546_v35, %v1668_v56 }
 0x502   : > { %v1717_v24 = vmul.f32 1.442695, %v3628_v18 }
 0x503   : > { %v2606_v16 = vpop.eup %2605  ;;  %v1723_v17 = vmul.f32 1.442695, %v3621_v3  ;;  %v1715_v19 = vmul.f32 1.442695, %v3624_v7 }
 0x504   : > { %v2608_v20 = vpop.eup %2607  ;;  %v1753_v21 = vsel %vm1648_vm0, %v2606_v16, 0.0 }
 0x505   : > { %2609 = vpow2.f32 %v1723_v17  ;;  %1777 = vadd.xlane.f32.xlu0 %v1753_v21  ;;  %v1757_v22 = vsel %vm1648_vm0, %v2608_v20, 0.0 }
 0x506   : > { %2611 = vpow2.f32 %v1715_v19  ;;  %1785 = vadd.xlane.f32.xlu1 %v1757_v22 }
 0x507   : > { %v1686_v25 = vpop.xlane.xlu1 %1685  ;;  %2613 = vpow2.f32 %v1717_v24 }
 0x508   : > { %v3637_v26 = vsub.f32 %v3554_v0, %v1686_v25  ;;  %v1684_v28 = vpop.xlane.xlu0 %1683 }
 0x509   : > { %v3640_v29 = vsub.f32 %v3559_v44, %v1684_v28 }
 0x50a   : > { %v1733_v30 = vmul.f32 1.442695, %v3637_v26 }
 0x50b   : > { %v2610_v31 = vpop.eup %2609  ;;  %v1731_v32 = vmul.f32 1.442695, %v3640_v29 }
 0x50c   : > { %v2612_v34 = vpop.eup %2611  ;;  %2615 = vpow2.f32 %v1733_v30  ;;  %v1750_v35 = vsel %vm1648_vm0, %v2610_v31, 0.0 }
 0x50d   : > { %2617 = vpow2.f32 %v1731_v32  ;;  %1771 = vadd.xlane.f32.xlu0 %v1750_v35  ;;  %v1746_v36 = vsel %vm1648_vm0, %v2612_v34, 0.0  ;;  %v2614_v0 = vpop.eup %2613 }
 0x50e   : > { %1763 = vadd.xlane.f32.xlu2 %v1746_v36  ;;  %v1688_v37 = vpop.xlane.xlu2 %1687  ;;  %v1747_v54 = vsel %vm1648_vm0, %v2614_v0, 0.0 }
 0x50f   : > { %v3649_v39 = vsub.f32 %v3571_v50, %v1688_v37  ;;  %v1672_v40 = vpop.xlane.xlu1 %1671 }
 0x510   : > { %v1678_v41 = vpop.xlane.xlu0 %1677  ;;  %v3656_v46 = vsub.f32 %v3567_v49, %v1672_v40 }
 0x511   : > { %v1735_v43 = vmul.f32 1.442695, %v3649_v39  ;;  %v3653_v44 = vsub.f32 %v3575_v52, %v1678_v41 }
 0x512   : > { %v2616_v45 = vpop.eup %2615  ;;  %v1719_v52 = vmul.f32 1.442695, %v3656_v46 }
 0x513   : > { %v2618_v47 = vpop.eup %2617  ;;  %2619 = vpow2.f32 %v1735_v43  ;;  %v1725_v48 = vmul.f32 1.442695, %v3653_v44  ;;  %v1755_v50 = vsel %vm1648_vm0, %v2616_v45, 0.0 }
 0x514   : > { %v1754_v55 = vsel %vm1648_vm0, %v2618_v47, 0.0 }
 0x515   : > { %2621 = vpow2.f32 %v1725_v48  ;;  %1765 = vadd.xlane.f32.xlu0 %v1747_v54  ;;  %1779 = vadd.xlane.f32.xlu1 %v1754_v55 }
 0x516   : > { %1781 = vadd.xlane.f32.xlu2 %v1755_v50  ;;  %v1694_v49 = vpop.xlane.xlu2 %1693  ;;  %2623 = vpow2.f32 %v1719_v52 }
 0x517   : > { %v3667_v57 = vsub.f32 %v3585_v60, %v1694_v49  ;;  %v1680_v58 = vpop.xlane.xlu1 %1679 }
 0x518   : > { %v3670_v59 = vsub.f32 %v3589_v61, %v1680_v58  ;;  %v1696_v63 = vpop.xlane.xlu0 %1695 }
 0x519   : > { %v2620_v2 = vpop.eup %2619  ;;  %v1741_v8 = vmul.f32 1.442695, %v3667_v57  ;;  %v3675_v9 = vsub.f32 %v3593_v62, %v1696_v63 }
 0x51a   : > { %v1727_v6 = vmul.f32 1.442695, %v3670_v59  ;;  %v1756_v60 = vsel %vm1648_vm0, %v2620_v2, 0.0 }
 0x51b   : > { %v2622_v33 = vpop.eup %2621  ;;  %2625 = vpow2.f32 %v1741_v8  ;;  %v1743_v10 = vmul.f32 1.442695, %v3675_v9 }
 0x51c   : > { %2627 = vpow2.f32 %v1727_v6  ;;  %v1751_v61 = vsel %vm1648_vm0, %v2622_v33, 0.0  ;;  %v2624_v14 = vpop.eup %2623 }
 0x51d   : > { %1783 = vadd.xlane.f32.xlu0 %v1756_v60  ;;  %1773 = vadd.xlane.f32.xlu1 %v1751_v61  ;;  %2629 = vpow2.f32 %v1743_v10  ;;  %v1748_v51 = vsel %vm1648_vm0, %v2624_v14, 0.0 }
 0x51f   : > { %v1692_v12 = vpop.xlane.xlu1 %1691 }
 0x520   : > { %v3683_v15 = vsub.f32 %v3601_v1, %v1692_v12 }
 0x521   : > { %v2626_v13 = vpop.eup %2625 }
 0x522   : > { %v2628_v27 = vpop.eup %2627  ;;  %v1739_v62 = vmul.f32 1.442695, %v3683_v15  ;;  %v1759_v42 = vsel %vm1648_vm0, %v2626_v13, 0.0 }
 0x523   : > { %v1752_v38 = vsel %vm1648_vm0, %v2628_v27, 0.0  ;;  %v2630_v1 = vpop.eup %2629 }
 0x524   : > { %2631 = vpow2.f32 %v1739_v62  ;;  %1775 = vadd.xlane.f32.xlu2 %v1752_v38  ;;  %v1760_v17 = vsel %vm1648_vm0, %v2630_v1, 0.0 }
 0x525   : > { %1789 = vadd.xlane.f32.xlu0 %v1759_v42  ;;  %1767 = vadd.xlane.f32.xlu1 %v1748_v51 }
 0x52a   : > { %v2632_v56 = vpop.eup %2631 }
 0x52b   : > { %v1758_v16 = vsel %vm1648_vm0, %v2632_v56, 0.0 }
 0x52c   : > { %1787 = vadd.xlane.f32.xlu2 %v1758_v16 }
 0x52d   : > { %1791 = vadd.xlane.f32.xlu1 %v1760_v17 }
 0x56f   : > { %v1762_v19 = vpop.xlane.xlu1 %1761 }
 0x570   : > { %v1770_v20 = vpop.xlane.xlu2 %1769  ;;  %2633 = vlog2.f32 %v1762_v19 }
 0x571   : > { %2635 = vlog2.f32 %v1770_v20 }
 0x576   : > { %v2634_v21 = vpop.eup %2633 }
 0x577   : > { %v2636_v22 = vpop.eup %2635  ;;  %v1794_v24 = vmul.f32 0.6931472, %v2634_v21 }
 0x578   : > { %v1802_v25 = vmul.f32 0.6931472, %v2636_v22  ;;  %v1778_v28 = vpop.xlane.xlu0 %1777 }
 0x579   : > { %v1825_v30 = vsub.f32 %v3604_v4, %v1794_v24  ;;  %v1786_v31 = vpop.xlane.xlu1 %1785  ;;  %2637 = vlog2.f32 %v1778_v28 }
 0x57a   : > { %v1829_v23 = vsub.f32 %v3606_v5, %v1802_v25  ;;  %2639 = vlog2.f32 %v1786_v31 }
 0x57b   : > { %1841 = vst [vmem:[%s3245_s11] sm:$0xff] %v1825_v30 }
 0x57c   : > { %1845 = vst [vmem:[%s3245_s11 + $0x20] sm:$0xff] %v1829_v23 }
 0x57f   : > { %v2638_v32 = vpop.eup %2637 }
 0x580   : > { %v2640_v34 = vpop.eup %2639  ;;  %v1810_v35 = vmul.f32 0.6931472, %v2638_v32  ;;  %v1772_v36 = vpop.xlane.xlu0 %1771 }
 0x581   : > { %v1818_v37 = vmul.f32 0.6931472, %v2640_v34  ;;  %v1764_v40 = vpop.xlane.xlu2 %1763  ;;  %2641 = vlog2.f32 %v1772_v36 }
 0x582   : > { %v1833_v41 = vsub.f32 %v3610_v53, %v1810_v35  ;;  %2643 = vlog2.f32 %v1764_v40 }
 0x583   : > { %v1837_v4 = vsub.f32 %v3612_v11, %v1818_v37 }
 0x584   : > { %1849 = vst [vmem:[%s3245_s11 + $0x40] sm:$0xff] %v1833_v41 }
 0x585   : > { %1853 = vst [vmem:[%s3245_s11 + $0x60] sm:$0xff] %v1837_v4 }
 0x587   : > { %v2642_v5 = vpop.eup %2641 }
 0x588   : > { %v2644_v0 = vpop.eup %2643  ;;  %v1804_v43 = vmul.f32 0.6931472, %v2642_v5  ;;  %v1780_v45 = vpop.xlane.xlu1 %1779 }
 0x589   : > { %v1766_v47 = vpop.xlane.xlu0 %1765  ;;  %v1796_v48 = vmul.f32 0.6931472, %v2644_v0  ;;  %v1782_v50 = vpop.xlane.xlu2 %1781  ;;  %2645 = vlog2.f32 %v1780_v45 }
 0x58a   : > { %v1830_v54 = vsub.f32 %v3621_v3, %v1804_v43  ;;  %2647 = vlog2.f32 %v1782_v50 }
 0x58b   : > { %v1826_v53 = vsub.f32 %v3624_v7, %v1796_v48  ;;  %2649 = vlog2.f32 %v1766_v47 }
 0x58c   : > { %1846 = vst [vmem:[%s3245_s11 + $0x28] sm:$0xff] %v1830_v54 }
 0x58d   : > { %1842 = vst [vmem:[%s3245_s11 + $0x8] sm:$0xff] %v1826_v53 }
 0x58f   : > { %v2646_v11 = vpop.eup %2645 }
 0x590   : > { %v2648_v55 = vpop.eup %2647  ;;  %v1812_v52 = vmul.f32 0.6931472, %v2646_v11  ;;  %v1774_v49 = vpop.xlane.xlu1 %1773 }
 0x591   : > { %v1784_v58 = vpop.xlane.xlu0 %1783  ;;  %v2650_v63 = vpop.eup %2649  ;;  %v1814_v2 = vmul.f32 0.6931472, %v2648_v55  ;;  %2651 = vlog2.f32 %v1774_v49 }
 0x592   : > { %v1834_v8 = vsub.f32 %v3640_v29, %v1812_v52  ;;  %v1798_v3 = vmul.f32 0.6931472, %v2650_v63  ;;  %2653 = vlog2.f32 %v1784_v58 }
 0x593   : > { %v1835_v7 = vsub.f32 %v3637_v26, %v1814_v2 }
 0x594   : > { %1850 = vst [vmem:[%s3245_s11 + $0x48] sm:$0xff] %v1834_v8  ;;  %v1827_v6 = vsub.f32 %v3628_v18, %v1798_v3 }
 0x595   : > { %1851 = vst [vmem:[%s3245_s11 + $0x50] sm:$0xff] %v1835_v7 }
 0x596   : > { %1843 = vst [vmem:[%s3245_s11 + $0x10] sm:$0xff] %v1827_v6 }
 0x597   : > { %v2652_v33 = vpop.eup %2651  ;;  %v1776_v60 = vpop.xlane.xlu2 %1775 }
 0x598   : > { %v2654_v61 = vpop.eup %2653  ;;  %v1806_v10 = vmul.f32 0.6931472, %v2652_v33  ;;  %2655 = vlog2.f32 %v1776_v60  ;;  %v1768_v12 = vpop.xlane.xlu1 %1767 }
 0x599   : > { %v1790_v14 = vpop.xlane.xlu0 %1789  ;;  %v1816_v13 = vmul.f32 0.6931472, %v2654_v61  ;;  %2657 = vlog2.f32 %v1768_v12 }
 0x59a   : > { %v1831_v29 = vsub.f32 %v3653_v44, %v1806_v10  ;;  %2659 = vlog2.f32 %v1790_v14 }
 0x59b   : > { %v1836_v26 = vsub.f32 %v3649_v39, %v1816_v13 }
 0x59c   : > { %1847 = vst [vmem:[%s3245_s11 + $0x30] sm:$0xff] %v1831_v29 }
 0x59d   : > { %1852 = vst [vmem:[%s3245_s11 + $0x58] sm:$0xff] %v1836_v26 }
 0x59e   : > { %v2656_v18 = vpop.eup %2655 }
 0x59f   : > { %v2658_v27 = vpop.eup %2657  ;;  %v1808_v62 = vmul.f32 0.6931472, %v2656_v18  ;;  %v1788_v38 = vpop.xlane.xlu2 %1787 }
 0x5a0   : > { %v2660_v42 = vpop.eup %2659  ;;  %v1800_v51 = vmul.f32 0.6931472, %v2658_v27  ;;  %2661 = vlog2.f32 %v1788_v38  ;;  %v1792_v1 = vpop.xlane.xlu1 %1791 }
 0x5a1   : > { %v1832_v44 = vsub.f32 %v3670_v59, %v1808_v62  ;;  %v1822_v56 = vmul.f32 0.6931472, %v2660_v42  ;;  %2663 = vlog2.f32 %v1792_v1 }
 0x5a2   : > { %v1828_v39 = vsub.f32 %v3656_v46, %v1800_v51 }
 0x5a3   : > { %1848 = vst [vmem:[%s3245_s11 + $0x38] sm:$0xff] %v1832_v44  ;;  %v1839_v16 = vsub.f32 %v3667_v57, %v1822_v56 }
 0x5a4   : > { %1844 = vst [vmem:[%s3245_s11 + $0x18] sm:$0xff] %v1828_v39 }
 0x5a5   : > { %1855 = vst [vmem:[%s3245_s11 + $0x70] sm:$0xff] %v1839_v16 }
 0x5a6   : > { %v2662_v17 = vpop.eup %2661 }
 0x5a7   : > { %v2664_v19 = vpop.eup %2663  ;;  %v1820_v20 = vmul.f32 0.6931472, %v2662_v17 }
 0x5a8   : > { %v1824_v21 = vmul.f32 0.6931472, %v2664_v19 }
 0x5a9   : > { %v1838_v22 = vsub.f32 %v3683_v15, %v1820_v20 }
 0x5aa   : > { %v1840_v24 = vsub.f32 %v3675_v9, %v1824_v21 }
 0x5ab   : > { %1854 = vst [vmem:[%s3245_s11 + $0x68] sm:$0xff] %v1838_v22 }
 0x5ac   : > { %1856 = vst [vmem:[%s3245_s11 + $0x78] sm:$0xff] %v1840_v24 }
 0x5ad PF: > { %s3817_s25 = sld [smem:[#allocation35_spill]]  ;;  %s1870_s12 = sshll.u32 %s3245_s11, 4  ;;  %s1871_s12 = int_to_ptr.vmem [resolvable:$true] %s1870_s12 }
 0x5ae   : > { %s1858_s8 = scalar_lea.sflag [#allocation6], %s454_s1 }
 0x5b3   : > { %s1869_s29 = scalar_lea.hbm %s3817_s25, %s2173_s16  ;;  %s2880_s15 = scalar_lea.hbm %s3817_s25, 256 }
 0x5b4   : > { %s1872_s27 = sshll.u32 %s1869_s29, 4  ;;  %s1873_s27 = int_to_ptr.hbm [resolvable:$true] %s1872_s27 }
 0x5b5   : > { %s2874_s13 = sshra.s32 %s1873_s27, 4  ;;  %s2875_s13 = int_to_ptr.hbm [resolvable:$true] %s2874_s13 }
 0x5b6   : > { %s2876_s14 = scalar_lea.hbm %s2875_s13, 128  ;;  %p2881_p0 = scmp.lt.s32.totalorder %s2875_s13, %s3817_s25 }
 0x5b7   : > { %p2877_p11 = scmp.ne.s32.totalorder %s2875_s13, %s2876_s14  ;;  %p2882_p2 = scmp.lt.s32.totalorder %s2880_s15, %s2876_s14 }
 0x5b9   : > { %p2878_p12 = pnand %p2877_p11, %p3190_p5  ;;  %p2883_p4 = por %p2882_p2, %p2881_p0 }
 0x5bb   : > { %p2879_p13 = pneg %p2878_p12 }
 0x5bd   : > { %p2884_p7 = pnand %p2883_p4, %p2879_p13 }
 0x5bf   : > { %2887 = shalt.err (!%p2884_p7)
}
 0x5c0   : > { %s2988_s1 = smov 128   ;;  %s2989_s11 = smov 8  }
 0x5c1   : > { %2480 = dma.vmem_to_hbm [thread:$0]  (%p3190_p5), %s1871_s12, 2048, %s1873_s27, %s1858_s8, %s2988_s1, %s2988_s1, %s2989_s11  }
 0x5c2 PF: > { %p2522_p3 = scmp.ge.s32.totalorder %s2978_s24, 2  ;;  %s1887_s16 = sand.u32 1, %s2950_s17  }
 0x5c3   : > { %s1888_s0 = scalar_lea.sflag [#allocation6], %s1887_s16 }
 0x5c4   : > { %p2506_p8 = pnand %p2522_p3, %p3195_p6 }
 0x5c6   : > { %p2507_p9 = pneg %p2506_p8 }
 0x5c8   : > { %2945 = dma.done.wait (%p2507_p9), %s1888_s0, 2048  }
 0x5c9   : > { %2947 = vsyncadd (%p2507_p9), %s1888_s0, 4294965248  ;;  %s31_s24 = sadd.s32 1, %s2978_s24   ;;  %s3818_s30 = sld [smem:[#allocation25_spill]] }
 0x5ca   : > { %p28_p1 = scmp.ge.s32.totalorder %s31_s24, 8   ;;  %s3819_s17 = smov %s2954_s18 }
 0x5cb   : > { %s3820_s18 = smov %s2958_s19  ;;  %s3821_s19 = smov %s3177_s5 }
 0x5cc   : > { %s3822_s20 = smov %s2970_s22  ;;  %s3823_s21 = smov %s2974_s23 }
 0x5cd   : > { %s3824_s22 = smov %s3827_s28  ;;  %30 = sbr.rel (!%p28_p1) target bundleno = 22 (0x16), region = 148 }
 0x5cf   : > { %s3825_s23 = smov %s3818_s30 }
 0x5d2   :  { %1894 = vsyncpa [#allocation5], 1 }
 0x5d3   :  { %1896 = vsyncpa [#allocation5 + $0x1], 1 }
 0x5d4   :  { %1897 = vsyncpa [#allocation10], 1 }
 0x5d5   :  { %1899 = vsyncpa [#allocation10 + $0x1], 1 }
 0x5d6   :  { %1900 = vsyncpa [#allocation13], 1 }
 0x5d7   :  { %1901 = vsyncpa [#allocation16], 1 }
 0x5d8   :  { %1902 = vsyncpa [#allocation6], 1 }
 0x5d9   :  { %1904 = vsyncpa [#allocation6 + $0x1], 1 }
 0x5da   :  { %1905 = vsyncpa [#allocation7], 1 }
 0x5db   :  { %1907 = vsyncpa [#allocation7 + $0x1], 1 }

</bundles_post_ra>
